<compile_context>
chip_gen: v6e
topology: v6e:2x2x1
jax: 0.10.0
libtpu: 0.0.40
codegen_flags: <defaults>
</compile_context>

<pallas_src>
import math
from functools import partial

import jax
import jax.numpy as jnp
from jax.experimental import pallas as pl
from jax.experimental.pallas import tpu as pltpu


def shortnet_kernel(xT_ref, p1_ref, p2_ref, p3_ref, o_ref, *, chunk):
    H = p2_ref.shape[1] - 1                 # num_hid; p2 = [w2 | b2] : (H+1, H+1)
    tn = o_ref.shape[1]
    n_chunks = tn // chunk

    # Parameters: one load per grid step, hoisted out of the chunk loop.
    p1 = p1_ref[...]                        # (2H+1, 3) rows = [fc1_0; fc1_1; fc1_2], cols = [w_x0, w_x1, b]
    w2 = p2_ref[:, 0:H]                     # (H+1, H)  rows = [fc2_0; fc2_1]
    b2 = p2_ref[:, H:H + 1]                 # (H+1, 1)
    w3 = p3_ref[:, 0:H]                     # (1, H)    fc3_0
    b3 = p3_ref[:, H:H + 1]                 # (1, 1)

    # Copy-free sublane slices (H = multiple of 8 keeps these on tile bounds).
    wA = p1[0:H, :]                         # fc1_0
    wB = p1[H:2 * H, :]                     # fc1_1
    wC = p1[2 * H:2 * H + 1, :]             # fc1_2

    # Static chunk loop: every lane offset is a compile-time constant
    # (equivalent to lax.fori_loop(..., unroll=True) at this trip count).
    for c in range(n_chunks):
        lo, hi = c * chunk, (c + 1) * chunk
        x = xT_ref[:, lo:hi].astype(jnp.float32)          # (2, chunk)
        x0 = x[0:1, :]
        x1 = x[1:2, :]

        # --- layer 1 / fc1_0 only: keep just {x, hid1} live across the MXU op ---
        hid1 = jnp.tanh(wA[:, 0:1] * x0 + wA[:, 1:2] * x1 + wA[:, 2:3])   # (H, chunk)

        # --- layer 2: fc2_0 and fc2_1 fused into one MXU matmul ---
        y2 = jnp.dot(w2, hid1, preferred_element_type=jnp.float32) + b2   # (H+1, chunk)

        # --- layer 1 / fc1_1 (deferred until needed) ---
        y1_1 = wB[:, 0:1] * x0 + wB[:, 1:2] * x1 + wB[:, 2:3]             # (H, chunk)

        hid2 = jnp.tanh(y1_1 + y2[0:H, :])                                # (H, chunk)

        # --- layer 3 ---
        y3 = jnp.dot(w3, hid2, preferred_element_type=jnp.float32) + b3   # (1, chunk)

        # --- layer 1 / fc1_2 (deferred) ---
        y1_2 = wC[:, 0:1] * x0 + wC[:, 1:2] * x1 + wC[:, 2:3]             # (1, chunk)

        z = y1_2 + y2[H:H + 1, :] + y3
        out = 0.5 * (jnp.tanh(0.5 * z) + 1.0)          # sigmoid via the EUP tanh path
        o_ref[:, lo:hi] = out.astype(o_ref.dtype)      # lane-dense 256-lane store


@partial(jax.jit, static_argnames=("tile_n", "chunk"))
def shortnet_forward(x, packed, *, tile_n=1024, chunk=256):
    """x: (N, 2) float32.  packed: dict from pack_params()."""
    N, F = x.shape
    assert F == 2
    assert chunk % 128 == 0, "chunk must be lane-aligned"
    assert tile_n % chunk == 0, "tile_n must be a multiple of chunk"

    n_tiles = pl.cdiv(N, tile_n)
    n_pad = n_tiles * tile_n
    if n_pad != N:
        x = jnp.pad(x, ((0, n_pad - N), (0, 0)))       # zero rows sliced off below
    xT = x.T                                           # (2, n_pad)

    def resident(arr):
        # Whole (small) parameter slab as one block; constant block index ->
        # DMA'd once, stays resident in VMEM across all grid steps.
        return pl.BlockSpec(arr.shape, lambda i: (0, 0))

    p1, p2, p3 = packed["p1"], packed["p2"], packed["p3"]
    fn = pl.pallas_call(
        partial(shortnet_kernel, chunk=chunk),
        out_shape=jax.ShapeDtypeStruct((1, n_pad), jnp.float32),
        grid=(n_tiles,),
        in_specs=[
            pl.BlockSpec((2, tile_n), lambda i: (0, i)),   # x^T, tiled over batch
            resident(p1), resident(p2), resident(p3),
        ],
        out_specs=pl.BlockSpec((1, tile_n), lambda i: (0, i)),
        compiler_params=pltpu.CompilerParams(
            dimension_semantics=("parallel",),             # shards grid across TCs on v7x
        ),
    )
    out = fn(xT, p1, p2, p3)
    return out[0, :N].reshape(N, 1)


def init_params(key, num_hid):
    """PyTorch-style init: W ~ U(-1/sqrt(fan_in), +), shape (out, in); b shape (out,)."""
    def linear(key, fan_in, fan_out):
        kw, kb = jax.random.split(key)
        bound = 1.0 / jnp.sqrt(jnp.float32(fan_in))
        w = jax.random.uniform(kw, (fan_out, fan_in), jnp.float32, -bound, bound)
        b = jax.random.uniform(kb, (fan_out,), jnp.float32, -bound, bound)
        return w, b

    keys = jax.random.split(key, 6)
    w10, b10 = linear(keys[0], 2, num_hid)        # fc1_0
    w11, b11 = linear(keys[1], 2, num_hid)        # fc1_1
    w12, b12 = linear(keys[2], 2, 1)              # fc1_2
    w20, b20 = linear(keys[3], num_hid, num_hid)  # fc2_0
    w21, b21 = linear(keys[4], num_hid, 1)        # fc2_1
    w30, b30 = linear(keys[5], num_hid, 1)        # fc3_0
    return dict(w10=w10, b10=b10, w11=w11, b11=b11, w12=w12, b12=b12,
                w20=w20, b20=b20, w21=w21, b21=b21, w30=w30, b30=b30)


def pack_params(p):
    """Consolidate the 12 PyTorch tensors into 3 resident slabs (bias = last column)."""
    w1 = jnp.concatenate([p["w10"], p["w11"], p["w12"]], axis=0)      # (2H+1, 2)
    b1 = jnp.concatenate([p["b10"], p["b11"], p["b12"]])[:, None]     # (2H+1, 1)
    p1 = jnp.concatenate([w1, b1], axis=1)                            # (2H+1, 3)
    w2 = jnp.concatenate([p["w20"], p["w21"]], axis=0)                # (H+1, H)
    b2 = jnp.concatenate([p["b20"], p["b21"]])[:, None]               # (H+1, 1)
    p2 = jnp.concatenate([w2, b2], axis=1)                            # (H+1, H+1)
    p3 = jnp.concatenate([p["w30"], p["b30"][:, None]], axis=1)       # (1, H+1)
    return dict(p1=p1, p2=p2, p3=p3)


def shortnet_ref(x, p):
    """Pure-JAX reference mirroring the PyTorch forward (K=2 layers as explicit FMAs)."""
    def lin2(x, w, b):   # (N,2) x (out,2) -> (N,out)
        return x[:, 0:1] * w[:, 0][None, :] + x[:, 1:2] * w[:, 1][None, :] + b

    y1_0 = lin2(x, p["w10"], p["b10"])
    y1_1 = lin2(x, p["w11"], p["b11"])
    y1_2 = lin2(x, p["w12"], p["b12"])
    hid1 = jnp.tanh(y1_0)
    y2_0 = hid1 @ p["w20"].T + p["b20"]
    y2_1 = hid1 @ p["w21"].T + p["b21"]
    hid2 = jnp.tanh(y1_1 + y2_0)
    y3_0 = hid2 @ p["w30"].T + p["b30"]
    return jax.nn.sigmoid(y1_2 + y2_1 + y3_0)


if __name__ == "__main__":
    key = jax.random.PRNGKey(0)
    k_param, k_x = jax.random.split(key)

    num_hid = 32
    batch = 2000                    # not a multiple of tile_n: exercises padding
    tile_n = 1024                   # grid=(2,) -> one tile per TensorCore on v7x
    chunk = 256                     # in-kernel lane chunk: bounds vreg pressure

    raw = init_params(k_param, num_hid)
    packed = pack_params(raw)
    x = jax.random.normal(k_x, (batch, 2), jnp.float32)

    out = shortnet_forward(x, packed, tile_n=tile_n, chunk=chunk)
    out = jax.block_until_ready(out)

    ref = shortnet_ref(x, raw)
    assert out.shape == (batch, 1)
    # Tolerance relaxed to 1e-4: in-kernel tanh uses the EUP approximation,
    # which may differ slightly from the XLA HLO tanh expansion across chips.
    assert jnp.allclose(out, ref, atol=1e-4, rtol=1e-4), (
        f"max abs diff {jnp.max(jnp.abs(out - ref))}"
    )
    print("KERNEL_OK")
</pallas_src>

<mosaic_0001>
module attributes {stable_mosaic.version = 11 : i64} {
  func.func @shortnet_kernel(%arg0: i32, %arg1: memref<2x1024xf32, #tpu.memory_space<vmem>>, %arg2: memref<65x3xf32, #tpu.memory_space<vmem>>, %arg3: memref<33x33xf32, #tpu.memory_space<vmem>>, %arg4: memref<1x33xf32, #tpu.memory_space<vmem>>, %arg5: memref<1x1024xf32, #tpu.memory_space<vmem>>) attributes {dimension_semantics = [#tpu.dimension_semantics<parallel>], iteration_bounds = array<i64: 2>, scalar_prefetch = 0 : i64, scratch_operands = 0 : i64, tpu.core_type = #tpu.core_type<tc>, window_params = [{transform_indices = @transform_0, window_bounds = array<i64: 2, 1024>}, {pipeline_mode = #tpu.pipeline_mode<synchronous>, transform_indices = @transform_1, window_bounds = array<i64: 65, 3>}, {pipeline_mode = #tpu.pipeline_mode<synchronous>, transform_indices = @transform_2, window_bounds = array<i64: 33, 33>}, {pipeline_mode = #tpu.pipeline_mode<synchronous>, transform_indices = @transform_3, window_bounds = array<i64: 1, 33>}, {transform_indices = @transform_4, window_bounds = array<i64: 1, 1024>}]} {
    %c0 = arith.constant 0 : index
    %c0_0 = arith.constant 0 : index
    %0 = vector.load %arg2[%c0, %c0_0] : memref<65x3xf32, #tpu.memory_space<vmem>>, vector<65x3xf32>
    %c0_1 = arith.constant 0 : index
    %c0_2 = arith.constant 0 : index
    %1 = vector.load %arg3[%c0_1, %c0_2] : memref<33x33xf32, #tpu.memory_space<vmem>>, vector<33x32xf32>
    %c0_3 = arith.constant 0 : index
    %c32 = arith.constant 32 : index
    %2 = vector.load %arg3[%c0_3, %c32] : memref<33x33xf32, #tpu.memory_space<vmem>>, vector<33x1xf32>
    %c0_4 = arith.constant 0 : index
    %c0_5 = arith.constant 0 : index
    %3 = vector.load %arg4[%c0_4, %c0_5] : memref<1x33xf32, #tpu.memory_space<vmem>>, vector<1x32xf32>
    %c0_6 = arith.constant 0 : index
    %c32_7 = arith.constant 32 : index
    %4 = vector.load %arg4[%c0_6, %c32_7] : memref<1x33xf32, #tpu.memory_space<vmem>>, vector<1x1xf32>
    %5 = vector.extract_strided_slice %0 {offsets = [0, 0], sizes = [32, 3], strides = [1, 1]} : vector<65x3xf32> to vector<32x3xf32>
    %6 = vector.extract_strided_slice %0 {offsets = [32, 0], sizes = [32, 3], strides = [1, 1]} : vector<65x3xf32> to vector<32x3xf32>
    %7 = vector.extract_strided_slice %0 {offsets = [64, 0], sizes = [1, 3], strides = [1, 1]} : vector<65x3xf32> to vector<1x3xf32>
    %c0_8 = arith.constant 0 : index
    %c0_9 = arith.constant 0 : index
    %8 = vector.load %arg1[%c0_8, %c0_9] : memref<2x1024xf32, #tpu.memory_space<vmem>>, vector<2x256xf32>
    %9 = vector.extract_strided_slice %8 {offsets = [0, 0], sizes = [1, 256], strides = [1, 1]} : vector<2x256xf32> to vector<1x256xf32>
    %10 = vector.extract_strided_slice %8 {offsets = [1, 0], sizes = [1, 256], strides = [1, 1]} : vector<2x256xf32> to vector<1x256xf32>
    %11 = vector.extract_strided_slice %5 {offsets = [0, 0], sizes = [32, 1], strides = [1, 1]} : vector<32x3xf32> to vector<32x1xf32>
    %12 = vector.broadcast %11 : vector<32x1xf32> to vector<32x256xf32>
    %13 = vector.broadcast %9 : vector<1x256xf32> to vector<32x256xf32>
    %14 = arith.mulf %12, %13 : vector<32x256xf32>
    %15 = vector.extract_strided_slice %5 {offsets = [0, 1], sizes = [32, 1], strides = [1, 1]} : vector<32x3xf32> to vector<32x1xf32>
    %16 = vector.broadcast %15 : vector<32x1xf32> to vector<32x256xf32>
    %17 = vector.broadcast %10 : vector<1x256xf32> to vector<32x256xf32>
    %18 = arith.mulf %16, %17 : vector<32x256xf32>
    %19 = arith.addf %14, %18 : vector<32x256xf32>
    %20 = vector.extract_strided_slice %5 {offsets = [0, 2], sizes = [32, 1], strides = [1, 1]} : vector<32x3xf32> to vector<32x1xf32>
    %21 = vector.broadcast %20 : vector<32x1xf32> to vector<32x256xf32>
    %22 = arith.addf %19, %21 : vector<32x256xf32>
    %23 = math.tanh %22 : vector<32x256xf32>
    %cst = arith.constant dense<0.000000e+00> : vector<33x256xf32>
    %24 = tpu.matmul %1, %23, %cst {dimension_numbers = #tpu.dot_dimension_numbers<[1], [0], [0], [1], [0, 0, 1, 1], [], []>} : vector<33x32xf32>, vector<32x256xf32>, vector<33x256xf32> -> vector<33x256xf32>
    %25 = vector.broadcast %2 : vector<33x1xf32> to vector<33x256xf32>
    %26 = arith.addf %24, %25 : vector<33x256xf32>
    %27 = vector.extract_strided_slice %6 {offsets = [0, 0], sizes = [32, 1], strides = [1, 1]} : vector<32x3xf32> to vector<32x1xf32>
    %28 = vector.broadcast %27 : vector<32x1xf32> to vector<32x256xf32>
    %29 = vector.broadcast %9 : vector<1x256xf32> to vector<32x256xf32>
    %30 = arith.mulf %28, %29 : vector<32x256xf32>
    %31 = vector.extract_strided_slice %6 {offsets = [0, 1], sizes = [32, 1], strides = [1, 1]} : vector<32x3xf32> to vector<32x1xf32>
    %32 = vector.broadcast %31 : vector<32x1xf32> to vector<32x256xf32>
    %33 = vector.broadcast %10 : vector<1x256xf32> to vector<32x256xf32>
    %34 = arith.mulf %32, %33 : vector<32x256xf32>
    %35 = arith.addf %30, %34 : vector<32x256xf32>
    %36 = vector.extract_strided_slice %6 {offsets = [0, 2], sizes = [32, 1], strides = [1, 1]} : vector<32x3xf32> to vector<32x1xf32>
    %37 = vector.broadcast %36 : vector<32x1xf32> to vector<32x256xf32>
    %38 = arith.addf %35, %37 : vector<32x256xf32>
    %39 = vector.extract_strided_slice %26 {offsets = [0, 0], sizes = [32, 256], strides = [1, 1]} : vector<33x256xf32> to vector<32x256xf32>
    %40 = arith.addf %38, %39 : vector<32x256xf32>
    %41 = math.tanh %40 : vector<32x256xf32>
    %cst_10 = arith.constant dense<0.000000e+00> : vector<1x256xf32>
    %42 = tpu.matmul %3, %41, %cst_10 {dimension_numbers = #tpu.dot_dimension_numbers<[1], [0], [0], [1], [0, 0, 1, 1], [], []>} : vector<1x32xf32>, vector<32x256xf32>, vector<1x256xf32> -> vector<1x256xf32>
    %43 = vector.broadcast %4 : vector<1x1xf32> to vector<1x256xf32>
    %44 = arith.addf %42, %43 : vector<1x256xf32>
    %45 = vector.extract_strided_slice %7 {offsets = [0, 0], sizes = [1, 1], strides = [1, 1]} : vector<1x3xf32> to vector<1x1xf32>
    %46 = vector.broadcast %45 : vector<1x1xf32> to vector<1x256xf32>
    %47 = arith.mulf %46, %9 : vector<1x256xf32>
    %48 = vector.extract_strided_slice %7 {offsets = [0, 1], sizes = [1, 1], strides = [1, 1]} : vector<1x3xf32> to vector<1x1xf32>
    %49 = vector.broadcast %48 : vector<1x1xf32> to vector<1x256xf32>
    %50 = arith.mulf %49, %10 : vector<1x256xf32>
    %51 = arith.addf %47, %50 : vector<1x256xf32>
    %52 = vector.extract_strided_slice %7 {offsets = [0, 2], sizes = [1, 1], strides = [1, 1]} : vector<1x3xf32> to vector<1x1xf32>
    %53 = vector.broadcast %52 : vector<1x1xf32> to vector<1x256xf32>
    %54 = arith.addf %51, %53 : vector<1x256xf32>
    %55 = vector.extract_strided_slice %26 {offsets = [32, 0], sizes = [1, 256], strides = [1, 1]} : vector<33x256xf32> to vector<1x256xf32>
    %56 = arith.addf %54, %55 : vector<1x256xf32>
    %57 = arith.addf %56, %44 : vector<1x256xf32>
    %cst_11 = arith.constant 5.000000e-01 : f32
    %58 = vector.broadcast %cst_11 : f32 to vector<1x256xf32>
    %59 = arith.mulf %58, %57 : vector<1x256xf32>
    %60 = math.tanh %59 : vector<1x256xf32>
    %cst_12 = arith.constant 1.000000e+00 : f32
    %61 = vector.broadcast %cst_12 : f32 to vector<1x256xf32>
    %62 = arith.addf %60, %61 : vector<1x256xf32>
    %cst_13 = arith.constant 5.000000e-01 : f32
    %63 = vector.broadcast %cst_13 : f32 to vector<1x256xf32>
    %64 = arith.mulf %63, %62 : vector<1x256xf32>
    %c0_14 = arith.constant 0 : index
    %c0_15 = arith.constant 0 : index
    %65 = vector.load %arg5[%c0_14, %c0_15] : memref<1x1024xf32, #tpu.memory_space<vmem>>, vector<1x256xf32>
    tpu.vector_store %arg5[%c0_14, %c0_15], %64 {strides = array<i32>} : memref<1x1024xf32, #tpu.memory_space<vmem>>, vector<1x256xf32>,
    %c0_16 = arith.constant 0 : index
    %c256 = arith.constant 256 : index
    %66 = vector.load %arg1[%c0_16, %c256] : memref<2x1024xf32, #tpu.memory_space<vmem>>, vector<2x256xf32>
    %67 = vector.extract_strided_slice %66 {offsets = [0, 0], sizes = [1, 256], strides = [1, 1]} : vector<2x256xf32> to vector<1x256xf32>
    %68 = vector.extract_strided_slice %66 {offsets = [1, 0], sizes = [1, 256], strides = [1, 1]} : vector<2x256xf32> to vector<1x256xf32>
    %69 = vector.extract_strided_slice %5 {offsets = [0, 0], sizes = [32, 1], strides = [1, 1]} : vector<32x3xf32> to vector<32x1xf32>
    %70 = vector.broadcast %69 : vector<32x1xf32> to vector<32x256xf32>
    %71 = vector.broadcast %67 : vector<1x256xf32> to vector<32x256xf32>
    %72 = arith.mulf %70, %71 : vector<32x256xf32>
    %73 = vector.extract_strided_slice %5 {offsets = [0, 1], sizes = [32, 1], strides = [1, 1]} : vector<32x3xf32> to vector<32x1xf32>
    %74 = vector.broadcast %73 : vector<32x1xf32> to vector<32x256xf32>
    %75 = vector.broadcast %68 : vector<1x256xf32> to vector<32x256xf32>
    %76 = arith.mulf %74, %75 : vector<32x256xf32>
    %77 = arith.addf %72, %76 : vector<32x256xf32>
    %78 = vector.extract_strided_slice %5 {offsets = [0, 2], sizes = [32, 1], strides = [1, 1]} : vector<32x3xf32> to vector<32x1xf32>
    %79 = vector.broadcast %78 : vector<32x1xf32> to vector<32x256xf32>
    %80 = arith.addf %77, %79 : vector<32x256xf32>
    %81 = math.tanh %80 : vector<32x256xf32>
    %cst_17 = arith.constant dense<0.000000e+00> : vector<33x256xf32>
    %82 = tpu.matmul %1, %81, %cst_17 {dimension_numbers = #tpu.dot_dimension_numbers<[1], [0], [0], [1], [0, 0, 1, 1], [], []>} : vector<33x32xf32>, vector<32x256xf32>, vector<33x256xf32> -> vector<33x256xf32>
    %83 = vector.broadcast %2 : vector<33x1xf32> to vector<33x256xf32>
    %84 = arith.addf %82, %83 : vector<33x256xf32>
    %85 = vector.extract_strided_slice %6 {offsets = [0, 0], sizes = [32, 1], strides = [1, 1]} : vector<32x3xf32> to vector<32x1xf32>
    %86 = vector.broadcast %85 : vector<32x1xf32> to vector<32x256xf32>
    %87 = vector.broadcast %67 : vector<1x256xf32> to vector<32x256xf32>
    %88 = arith.mulf %86, %87 : vector<32x256xf32>
    %89 = vector.extract_strided_slice %6 {offsets = [0, 1], sizes = [32, 1], strides = [1, 1]} : vector<32x3xf32> to vector<32x1xf32>
    %90 = vector.broadcast %89 : vector<32x1xf32> to vector<32x256xf32>
    %91 = vector.broadcast %68 : vector<1x256xf32> to vector<32x256xf32>
    %92 = arith.mulf %90, %91 : vector<32x256xf32>
    %93 = arith.addf %88, %92 : vector<32x256xf32>
    %94 = vector.extract_strided_slice %6 {offsets = [0, 2], sizes = [32, 1], strides = [1, 1]} : vector<32x3xf32> to vector<32x1xf32>
    %95 = vector.broadcast %94 : vector<32x1xf32> to vector<32x256xf32>
    %96 = arith.addf %93, %95 : vector<32x256xf32>
    %97 = vector.extract_strided_slice %84 {offsets = [0, 0], sizes = [32, 256], strides = [1, 1]} : vector<33x256xf32> to vector<32x256xf32>
    %98 = arith.addf %96, %97 : vector<32x256xf32>
    %99 = math.tanh %98 : vector<32x256xf32>
    %cst_18 = arith.constant dense<0.000000e+00> : vector<1x256xf32>
    %100 = tpu.matmul %3, %99, %cst_18 {dimension_numbers = #tpu.dot_dimension_numbers<[1], [0], [0], [1], [0, 0, 1, 1], [], []>} : vector<1x32xf32>, vector<32x256xf32>, vector<1x256xf32> -> vector<1x256xf32>
    %101 = vector.broadcast %4 : vector<1x1xf32> to vector<1x256xf32>
    %102 = arith.addf %100, %101 : vector<1x256xf32>
    %103 = vector.extract_strided_slice %7 {offsets = [0, 0], sizes = [1, 1], strides = [1, 1]} : vector<1x3xf32> to vector<1x1xf32>
    %104 = vector.broadcast %103 : vector<1x1xf32> to vector<1x256xf32>
    %105 = arith.mulf %104, %67 : vector<1x256xf32>
    %106 = vector.extract_strided_slice %7 {offsets = [0, 1], sizes = [1, 1], strides = [1, 1]} : vector<1x3xf32> to vector<1x1xf32>
    %107 = vector.broadcast %106 : vector<1x1xf32> to vector<1x256xf32>
    %108 = arith.mulf %107, %68 : vector<1x256xf32>
    %109 = arith.addf %105, %108 : vector<1x256xf32>
    %110 = vector.extract_strided_slice %7 {offsets = [0, 2], sizes = [1, 1], strides = [1, 1]} : vector<1x3xf32> to vector<1x1xf32>
    %111 = vector.broadcast %110 : vector<1x1xf32> to vector<1x256xf32>
    %112 = arith.addf %109, %111 : vector<1x256xf32>
    %113 = vector.extract_strided_slice %84 {offsets = [32, 0], sizes = [1, 256], strides = [1, 1]} : vector<33x256xf32> to vector<1x256xf32>
    %114 = arith.addf %112, %113 : vector<1x256xf32>
    %115 = arith.addf %114, %102 : vector<1x256xf32>
    %cst_19 = arith.constant 5.000000e-01 : f32
    %116 = vector.broadcast %cst_19 : f32 to vector<1x256xf32>
    %117 = arith.mulf %116, %115 : vector<1x256xf32>
    %118 = math.tanh %117 : vector<1x256xf32>
    %cst_20 = arith.constant 1.000000e+00 : f32
    %119 = vector.broadcast %cst_20 : f32 to vector<1x256xf32>
    %120 = arith.addf %118, %119 : vector<1x256xf32>
    %cst_21 = arith.constant 5.000000e-01 : f32
    %121 = vector.broadcast %cst_21 : f32 to vector<1x256xf32>
    %122 = arith.mulf %121, %120 : vector<1x256xf32>
    %c0_22 = arith.constant 0 : index
    %c256_23 = arith.constant 256 : index
    %123 = vector.load %arg5[%c0_22, %c256_23] : memref<1x1024xf32, #tpu.memory_space<vmem>>, vector<1x256xf32>
    tpu.vector_store %arg5[%c0_22, %c256_23], %122 {strides = array<i32>} : memref<1x1024xf32, #tpu.memory_space<vmem>>, vector<1x256xf32>,
    %c0_24 = arith.constant 0 : index
    %c512 = arith.constant 512 : index
    %124 = vector.load %arg1[%c0_24, %c512] : memref<2x1024xf32, #tpu.memory_space<vmem>>, vector<2x256xf32>
    %125 = vector.extract_strided_slice %124 {offsets = [0, 0], sizes = [1, 256], strides = [1, 1]} : vector<2x256xf32> to vector<1x256xf32>
    %126 = vector.extract_strided_slice %124 {offsets = [1, 0], sizes = [1, 256], strides = [1, 1]} : vector<2x256xf32> to vector<1x256xf32>
    %127 = vector.extract_strided_slice %5 {offsets = [0, 0], sizes = [32, 1], strides = [1, 1]} : vector<32x3xf32> to vector<32x1xf32>
    %128 = vector.broadcast %127 : vector<32x1xf32> to vector<32x256xf32>
    %129 = vector.broadcast %125 : vector<1x256xf32> to vector<32x256xf32>
    %130 = arith.mulf %128, %129 : vector<32x256xf32>
    %131 = vector.extract_strided_slice %5 {offsets = [0, 1], sizes = [32, 1], strides = [1, 1]} : vector<32x3xf32> to vector<32x1xf32>
    %132 = vector.broadcast %131 : vector<32x1xf32> to vector<32x256xf32>
    %133 = vector.broadcast %126 : vector<1x256xf32> to vector<32x256xf32>
    %134 = arith.mulf %132, %133 : vector<32x256xf32>
    %135 = arith.addf %130, %134 : vector<32x256xf32>
    %136 = vector.extract_strided_slice %5 {offsets = [0, 2], sizes = [32, 1], strides = [1, 1]} : vector<32x3xf32> to vector<32x1xf32>
    %137 = vector.broadcast %136 : vector<32x1xf32> to vector<32x256xf32>
    %138 = arith.addf %135, %137 : vector<32x256xf32>
    %139 = math.tanh %138 : vector<32x256xf32>
    %cst_25 = arith.constant dense<0.000000e+00> : vector<33x256xf32>
    %140 = tpu.matmul %1, %139, %cst_25 {dimension_numbers = #tpu.dot_dimension_numbers<[1], [0], [0], [1], [0, 0, 1, 1], [], []>} : vector<33x32xf32>, vector<32x256xf32>, vector<33x256xf32> -> vector<33x256xf32>
    %141 = vector.broadcast %2 : vector<33x1xf32> to vector<33x256xf32>
    %142 = arith.addf %140, %141 : vector<33x256xf32>
    %143 = vector.extract_strided_slice %6 {offsets = [0, 0], sizes = [32, 1], strides = [1, 1]} : vector<32x3xf32> to vector<32x1xf32>
    %144 = vector.broadcast %143 : vector<32x1xf32> to vector<32x256xf32>
    %145 = vector.broadcast %125 : vector<1x256xf32> to vector<32x256xf32>
    %146 = arith.mulf %144, %145 : vector<32x256xf32>
    %147 = vector.extract_strided_slice %6 {offsets = [0, 1], sizes = [32, 1], strides = [1, 1]} : vector<32x3xf32> to vector<32x1xf32>
    %148 = vector.broadcast %147 : vector<32x1xf32> to vector<32x256xf32>
    %149 = vector.broadcast %126 : vector<1x256xf32> to vector<32x256xf32>
    %150 = arith.mulf %148, %149 : vector<32x256xf32>
    %151 = arith.addf %146, %150 : vector<32x256xf32>
    %152 = vector.extract_strided_slice %6 {offsets = [0, 2], sizes = [32, 1], strides = [1, 1]} : vector<32x3xf32> to vector<32x1xf32>
    %153 = vector.broadcast %152 : vector<32x1xf32> to vector<32x256xf32>
    %154 = arith.addf %151, %153 : vector<32x256xf32>
    %155 = vector.extract_strided_slice %142 {offsets = [0, 0], sizes = [32, 256], strides = [1, 1]} : vector<33x256xf32> to vector<32x256xf32>
    %156 = arith.addf %154, %155 : vector<32x256xf32>
    %157 = math.tanh %156 : vector<32x256xf32>
    %cst_26 = arith.constant dense<0.000000e+00> : vector<1x256xf32>
    %158 = tpu.matmul %3, %157, %cst_26 {dimension_numbers = #tpu.dot_dimension_numbers<[1], [0], [0], [1], [0, 0, 1, 1], [], []>} : vector<1x32xf32>, vector<32x256xf32>, vector<1x256xf32> -> vector<1x256xf32>
    %159 = vector.broadcast %4 : vector<1x1xf32> to vector<1x256xf32>
    %160 = arith.addf %158, %159 : vector<1x256xf32>
    %161 = vector.extract_strided_slice %7 {offsets = [0, 0], sizes = [1, 1], strides = [1, 1]} : vector<1x3xf32> to vector<1x1xf32>
    %162 = vector.broadcast %161 : vector<1x1xf32> to vector<1x256xf32>
    %163 = arith.mulf %162, %125 : vector<1x256xf32>
    %164 = vector.extract_strided_slice %7 {offsets = [0, 1], sizes = [1, 1], strides = [1, 1]} : vector<1x3xf32> to vector<1x1xf32>
    %165 = vector.broadcast %164 : vector<1x1xf32> to vector<1x256xf32>
    %166 = arith.mulf %165, %126 : vector<1x256xf32>
    %167 = arith.addf %163, %166 : vector<1x256xf32>
    %168 = vector.extract_strided_slice %7 {offsets = [0, 2], sizes = [1, 1], strides = [1, 1]} : vector<1x3xf32> to vector<1x1xf32>
    %169 = vector.broadcast %168 : vector<1x1xf32> to vector<1x256xf32>
    %170 = arith.addf %167, %169 : vector<1x256xf32>
    %171 = vector.extract_strided_slice %142 {offsets = [32, 0], sizes = [1, 256], strides = [1, 1]} : vector<33x256xf32> to vector<1x256xf32>
    %172 = arith.addf %170, %171 : vector<1x256xf32>
    %173 = arith.addf %172, %160 : vector<1x256xf32>
    %cst_27 = arith.constant 5.000000e-01 : f32
    %174 = vector.broadcast %cst_27 : f32 to vector<1x256xf32>
    %175 = arith.mulf %174, %173 : vector<1x256xf32>
    %176 = math.tanh %175 : vector<1x256xf32>
    %cst_28 = arith.constant 1.000000e+00 : f32
    %177 = vector.broadcast %cst_28 : f32 to vector<1x256xf32>
    %178 = arith.addf %176, %177 : vector<1x256xf32>
    %cst_29 = arith.constant 5.000000e-01 : f32
    %179 = vector.broadcast %cst_29 : f32 to vector<1x256xf32>
    %180 = arith.mulf %179, %178 : vector<1x256xf32>
    %c0_30 = arith.constant 0 : index
    %c512_31 = arith.constant 512 : index
    %181 = vector.load %arg5[%c0_30, %c512_31] : memref<1x1024xf32, #tpu.memory_space<vmem>>, vector<1x256xf32>
    tpu.vector_store %arg5[%c0_30, %c512_31], %180 {strides = array<i32>} : memref<1x1024xf32, #tpu.memory_space<vmem>>, vector<1x256xf32>,
    %c0_32 = arith.constant 0 : index
    %c768 = arith.constant 768 : index
    %182 = vector.load %arg1[%c0_32, %c768] : memref<2x1024xf32, #tpu.memory_space<vmem>>, vector<2x256xf32>
    %183 = vector.extract_strided_slice %182 {offsets = [0, 0], sizes = [1, 256], strides = [1, 1]} : vector<2x256xf32> to vector<1x256xf32>
    %184 = vector.extract_strided_slice %182 {offsets = [1, 0], sizes = [1, 256], strides = [1, 1]} : vector<2x256xf32> to vector<1x256xf32>
    %185 = vector.extract_strided_slice %5 {offsets = [0, 0], sizes = [32, 1], strides = [1, 1]} : vector<32x3xf32> to vector<32x1xf32>
    %186 = vector.broadcast %185 : vector<32x1xf32> to vector<32x256xf32>
    %187 = vector.broadcast %183 : vector<1x256xf32> to vector<32x256xf32>
    %188 = arith.mulf %186, %187 : vector<32x256xf32>
    %189 = vector.extract_strided_slice %5 {offsets = [0, 1], sizes = [32, 1], strides = [1, 1]} : vector<32x3xf32> to vector<32x1xf32>
    %190 = vector.broadcast %189 : vector<32x1xf32> to vector<32x256xf32>
    %191 = vector.broadcast %184 : vector<1x256xf32> to vector<32x256xf32>
    %192 = arith.mulf %190, %191 : vector<32x256xf32>
    %193 = arith.addf %188, %192 : vector<32x256xf32>
    %194 = vector.extract_strided_slice %5 {offsets = [0, 2], sizes = [32, 1], strides = [1, 1]} : vector<32x3xf32> to vector<32x1xf32>
    %195 = vector.broadcast %194 : vector<32x1xf32> to vector<32x256xf32>
    %196 = arith.addf %193, %195 : vector<32x256xf32>
    %197 = math.tanh %196 : vector<32x256xf32>
    %cst_33 = arith.constant dense<0.000000e+00> : vector<33x256xf32>
    %198 = tpu.matmul %1, %197, %cst_33 {dimension_numbers = #tpu.dot_dimension_numbers<[1], [0], [0], [1], [0, 0, 1, 1], [], []>} : vector<33x32xf32>, vector<32x256xf32>, vector<33x256xf32> -> vector<33x256xf32>
    %199 = vector.broadcast %2 : vector<33x1xf32> to vector<33x256xf32>
    %200 = arith.addf %198, %199 : vector<33x256xf32>
    %201 = vector.extract_strided_slice %6 {offsets = [0, 0], sizes = [32, 1], strides = [1, 1]} : vector<32x3xf32> to vector<32x1xf32>
    %202 = vector.broadcast %201 : vector<32x1xf32> to vector<32x256xf32>
    %203 = vector.broadcast %183 : vector<1x256xf32> to vector<32x256xf32>
    %204 = arith.mulf %202, %203 : vector<32x256xf32>
    %205 = vector.extract_strided_slice %6 {offsets = [0, 1], sizes = [32, 1], strides = [1, 1]} : vector<32x3xf32> to vector<32x1xf32>
    %206 = vector.broadcast %205 : vector<32x1xf32> to vector<32x256xf32>
    %207 = vector.broadcast %184 : vector<1x256xf32> to vector<32x256xf32>
    %208 = arith.mulf %206, %207 : vector<32x256xf32>
    %209 = arith.addf %204, %208 : vector<32x256xf32>
    %210 = vector.extract_strided_slice %6 {offsets = [0, 2], sizes = [32, 1], strides = [1, 1]} : vector<32x3xf32> to vector<32x1xf32>
    %211 = vector.broadcast %210 : vector<32x1xf32> to vector<32x256xf32>
    %212 = arith.addf %209, %211 : vector<32x256xf32>
    %213 = vector.extract_strided_slice %200 {offsets = [0, 0], sizes = [32, 256], strides = [1, 1]} : vector<33x256xf32> to vector<32x256xf32>
    %214 = arith.addf %212, %213 : vector<32x256xf32>
    %215 = math.tanh %214 : vector<32x256xf32>
    %cst_34 = arith.constant dense<0.000000e+00> : vector<1x256xf32>
    %216 = tpu.matmul %3, %215, %cst_34 {dimension_numbers = #tpu.dot_dimension_numbers<[1], [0], [0], [1], [0, 0, 1, 1], [], []>} : vector<1x32xf32>, vector<32x256xf32>, vector<1x256xf32> -> vector<1x256xf32>
    %217 = vector.broadcast %4 : vector<1x1xf32> to vector<1x256xf32>
    %218 = arith.addf %216, %217 : vector<1x256xf32>
    %219 = vector.extract_strided_slice %7 {offsets = [0, 0], sizes = [1, 1], strides = [1, 1]} : vector<1x3xf32> to vector<1x1xf32>
    %220 = vector.broadcast %219 : vector<1x1xf32> to vector<1x256xf32>
    %221 = arith.mulf %220, %183 : vector<1x256xf32>
    %222 = vector.extract_strided_slice %7 {offsets = [0, 1], sizes = [1, 1], strides = [1, 1]} : vector<1x3xf32> to vector<1x1xf32>
    %223 = vector.broadcast %222 : vector<1x1xf32> to vector<1x256xf32>
    %224 = arith.mulf %223, %184 : vector<1x256xf32>
    %225 = arith.addf %221, %224 : vector<1x256xf32>
    %226 = vector.extract_strided_slice %7 {offsets = [0, 2], sizes = [1, 1], strides = [1, 1]} : vector<1x3xf32> to vector<1x1xf32>
    %227 = vector.broadcast %226 : vector<1x1xf32> to vector<1x256xf32>
    %228 = arith.addf %225, %227 : vector<1x256xf32>
    %229 = vector.extract_strided_slice %200 {offsets = [32, 0], sizes = [1, 256], strides = [1, 1]} : vector<33x256xf32> to vector<1x256xf32>
    %230 = arith.addf %228, %229 : vector<1x256xf32>
    %231 = arith.addf %230, %218 : vector<1x256xf32>
    %cst_35 = arith.constant 5.000000e-01 : f32
    %232 = vector.broadcast %cst_35 : f32 to vector<1x256xf32>
    %233 = arith.mulf %232, %231 : vector<1x256xf32>
    %234 = math.tanh %233 : vector<1x256xf32>
    %cst_36 = arith.constant 1.000000e+00 : f32
    %235 = vector.broadcast %cst_36 : f32 to vector<1x256xf32>
    %236 = arith.addf %234, %235 : vector<1x256xf32>
    %cst_37 = arith.constant 5.000000e-01 : f32
    %237 = vector.broadcast %cst_37 : f32 to vector<1x256xf32>
    %238 = arith.mulf %237, %236 : vector<1x256xf32>
    %c0_38 = arith.constant 0 : index
    %c768_39 = arith.constant 768 : index
    %239 = vector.load %arg5[%c0_38, %c768_39] : memref<1x1024xf32, #tpu.memory_space<vmem>>, vector<1x256xf32>
    tpu.vector_store %arg5[%c0_38, %c768_39], %238 {strides = array<i32>} : memref<1x1024xf32, #tpu.memory_space<vmem>>, vector<1x256xf32>,
    return
  }
  func.func @transform_0(%arg0: i32) -> (i32, i32) {
    %c0_i32 = arith.constant 0 : i32
    %c0_i32_0 = arith.constant 0 : i32
    return %c0_i32, %arg0 : i32, i32
  }
  func.func @transform_1(%arg0: i32) -> (i32, i32) {
    %c0_i32 = arith.constant 0 : i32
    %c0_i32_0 = arith.constant 0 : i32
    %c0_i32_1 = arith.constant 0 : i32
    return %c0_i32, %c0_i32_0 : i32, i32
  }
  func.func @transform_2(%arg0: i32) -> (i32, i32) {
    %c0_i32 = arith.constant 0 : i32
    %c0_i32_0 = arith.constant 0 : i32
    %c0_i32_1 = arith.constant 0 : i32
    return %c0_i32, %c0_i32_0 : i32, i32
  }
  func.func @transform_3(%arg0: i32) -> (i32, i32) {
    %c0_i32 = arith.constant 0 : i32
    %c0_i32_0 = arith.constant 0 : i32
    %c0_i32_1 = arith.constant 0 : i32
    return %c0_i32, %c0_i32_0 : i32, i32
  }
  func.func @transform_4(%arg0: i32) -> (i32, i32) {
    %c0_i32 = arith.constant 0 : i32
    %c0_i32_0 = arith.constant 0 : i32
    return %c0_i32, %arg0 : i32, i32
  }
}

</mosaic_0001>

<bundles_post_ra>
// kernel: shortnet_forward.1
= control target key start
LH: loop header
LB: loop body
LE: loop exit
PB: predicated region body
PF: predicated region fallthrough
CT: control target
= control target key end

     0   :  { %s2018_s15 = smov 0   ;;  %s3007_s0 = inlined_call_operand.vmem [shape: f32[2,2048], index: 0, kind: input, shape index: {}]   ;;  %s3008_s1 = inlined_call_operand.vmem [shape: f32[65,3], index: 1, kind: input, shape index: {}]   ;;  %s3009_s2 = inlined_call_operand.vmem [shape: f32[33,33], index: 2, kind: input, shape index: {}]   ;;  %s3010_s3 = inlined_call_operand.vmem [shape: f32[1,33], index: 3, kind: input, shape index: {}]   ;;  %s3011_s4 = inlined_call_operand.vmem [shape: f32[1,2048], index: 4, kind: output, shape index: {}]  }
   0x1 LB: > { %s1756_s16 = sadd.s32 4294967295, %s1985_s15   ;;  %p1760_p0 = scmp.ge.s32.totalorder %s1985_s15, 1  ;;  %s1985_s15 = sphi %s2018_s15, %s14_s15  }
   0x2   : > { %p163_p1 = scmp.lt.s32.totalorder %s1985_s15, 3 }
   0x4   : > { %p164_p2 = pnand %p1760_p0, %p163_p1 }
   0x6   : > { %167 = sbr.rel (%p164_p2) target bundleno = 1381 (0x565), region = 36 }
   0xb   : > { %v202_v0 = vld [vmem:[%s3008_s1 + $0x18] sm:$0xff]  ;;  %v201_v1 = vld [vmem:[%s3008_s1 + $0x10] sm:$0xff]  ;;  %v3012_v2 = vlaneseq  ;;  %v1987_v3 = vmov 1   ;;  %v1988_v4 = vmov 0   ;;  %s1761_s21 = sshll.u32 %s1756_s16, 3  ;;  %v200_v6 = vld [vmem:[%s3008_s1 + $0x8] sm:$0xff] }
   0xc   : > { %1804 = vset.pattern.permute.xlu0 %v1987_v3  ;;  %1805 = vset.pattern.permute.xlu1 %v1988_v4  ;;  %p189_p3 = scmp.lt.s32.totalorder %s1761_s21, 15  ;;  %v199_v16 = vld [vmem:[%s3008_s1] sm:$0xff]  ;;  %v3013_v23 = vmov 2   ;;  %v3017_v24 = vmov 0.0   ;;  %v206_v25 = vld [vmem:[%s3008_s1 + $0x38] sm:$0xff]  ;;  %v205_v26 = vld [vmem:[%s3008_s1 + $0x30] sm:$0xff] }
   0xd   : > { %275 = vperm.xlu0 %1804, %v202_v0   ;;  %227 = vperm.xlu1 %1805, %v201_v1   ;;  %v2035_v5 = vshrl.u32 %v3012_v2, 7  ;;  %v2124_v27 = vld [vmem:[%s3009_s2 + $0x18] sm:$0xff]  ;;  %v3015_v28 = vmov 32   ;;  %v204_v29 = vld [vmem:[%s3008_s1 + $0x28] sm:$0xff]  ;;  %v203_v30 = vld [vmem:[%s3008_s1 + $0x20] sm:$0xff]  ;;  %vm369_vm0 = vcmask 261120  }
   0xe   : > { %s3143_s21 = smov (!%p189_p3, %s1761_s21), 15  ;;  %444 = vmatprep.mubr.f32.mxu0 %v3017_v24  ;;  %650 = vmatprep.mubr.f32.mxu1 %v3017_v24  ;;  %v2142_v31 = vld [vmem:[%s3009_s2 + $0x10] sm:$0xff]  ;;  %v2152_v32 = vld [vmem:[%s3009_s2 + $0x8] sm:$0xff]  ;;  %v2159_v33 = vld [vmem:[%s3009_s2] sm:$0xff] }
   0xf   : > { %3034 = vst [vmem:[#allocation2_spill] sm:$0xff] %v2035_v5  ;;  %v2043_v7 = vsub.s32 2, %v2035_v5  ;;  %s1762_s24 = sshll.u32 %s3143_s21, 1  ;;  %v2059_v10 = vsub.s32 1, %v2035_v5  ;;  %v2069_v13 = vsub.s32 3, %v2035_v5  ;;  %v2163_v34 = vsub.s32 0, %v2035_v5  ;;  %s2823_s30 = scalar_lea.vmem %s3011_s4, %s3143_s21 }
  0x10   : > { %s2050_s27 = scalar_lea.vmem %s3007_s0, %s1762_s24 }
  0x11   : > { %1806 = vset.pattern.permute.xlu1 %v1987_v3  ;;  %267 = vperm.xlu0 %1804, %v200_v6   ;;  %v2053_v8 = vld [vmem:[%s2050_s27 + $0x4] sm:$0xf]  ;;  %v2056_v9 = vld [vmem:[%s2050_s27 + $0x8] sm:$0xf]  ;;  %v2066_v12 = vld [vmem:[%s2050_s27 + $0xc] sm:$0xf] }
  0x12   : > { %271 = vperm.xlu1 %1806, %v201_v1   ;;  %v2063_v11 = vrot.slane %v2053_v8, %v2043_v7  ;;  %v2074_v14 = vrot.slane %v2056_v9, %v2043_v7  ;;  %v2078_v15 = vrot.slane %v2066_v12, %v2043_v7  ;;  %v2086_v17 = vrot.slane %v2053_v8, %v2059_v10 }
  0x13   : > { %v2090_v18 = vrot.slane %v2053_v8, %v2069_v13  ;;  %v2094_v19 = vrot.slane %v2056_v9, %v2059_v10  ;;  %v2098_v20 = vrot.slane %v2056_v9, %v2069_v13  ;;  %v2102_v21 = vrot.slane %v2066_v12, %v2059_v10  ;;  %3044 = vst [vmem:[#allocation12_spill] sm:$0xff] %v2163_v34 }
  0x14   : > { %3035 = vst [vmem:[#allocation3_spill] sm:$0xff] %v2063_v11  ;;  %3036 = vst [vmem:[#allocation4_spill] sm:$0xff] %v2074_v14  ;;  %v2106_v22 = vrot.slane %v2066_v12, %v2069_v13  ;;  %v2168_v35 = vrot.slane %v2053_v8, %v2163_v34  ;;  %v2176_v38 = vrot.slane %v2086_v17, %v2059_v10 }
  0x15   : > { %1808 = vset.pattern.permute.xlu0 %v1988_v4  ;;  %3037 = vst [vmem:[#allocation5_spill] sm:$0xff] %v2078_v15  ;;  %3038 = vst [vmem:[#allocation6_spill] sm:$0xff] %v2086_v17  ;;  %v2180_v39 = vrot.slane %v2090_v18, %v2059_v10  ;;  %v2188_v41 = vrot.slane %v2063_v11, %v2163_v34  ;;  %v2192_v42 = vrot.slane %v2056_v9, %v2163_v34 }
  0x16   : > { %1807 = vset.pattern.permute.xlu1 %v1988_v4  ;;  %232 = vperm.xlu0 %1808, %v202_v0   ;;  %3039 = vst [vmem:[#allocation7_spill] sm:$0xff] %v2090_v18  ;;  %3040 = vst [vmem:[#allocation8_spill] sm:$0xff] %v2094_v19  ;;  %v2184_v40 = vrot.slane %v2168_v35, %v2163_v34  ;;  %v2201_v45 = vrot.slane %v2066_v12, %v2163_v34 }
  0x17   : > { %222 = vperm.xlu1 %1807, %v200_v6   ;;  %3041 = vst [vmem:[#allocation9_spill] sm:$0xff] %v2098_v20  ;;  %3042 = vst [vmem:[#allocation10_spill] sm:$0xff] %v2102_v21  ;;  %v2213_v50 = vrot.slane %v2192_v42, %v2163_v34  ;;  %v2217_v51 = vrot.slane %v2074_v14, %v2163_v34  ;;  %v2221_v52 = vrot.slane %v2094_v19, %v2059_v10 }
  0x18   : > { %3043 = vst [vmem:[#allocation11_spill] sm:$0xff] %v2106_v22  ;;  %3045 = vst [vmem:[#allocation13_spill] sm:$0xff] %v2168_v35  ;;  %v2225_v53 = vrot.slane %v2098_v20, %v2059_v10  ;;  %v2229_v54 = vrot.slane %v2102_v21, %v2059_v10  ;;  %v2243_v60 = vrot.slane %v2201_v45, %v2163_v34 }
  0x19   : > { %3046 = vst [vmem:[#allocation14_spill] sm:$0xff] %v2192_v42  ;;  %3047 = vst [vmem:[#allocation15_spill] sm:$0xff] %v2201_v45  ;;  %v2247_v61 = vrot.slane %v2106_v22, %v2059_v10 }
  0x1a   : > { %217 = vperm.xlu0 %1808, %v199_v16  }
  0x1b   : > { %1809 = vset.pattern.permute.xlu1 %v3013_v23 }
  0x1c   : > { %325 = vperm.xlu1 %1809, %v202_v0  }
  0x1e   : > { %1812 = vset.pattern.permute.xlu0 %v3013_v23 }
  0x1f   : > { %317 = vperm.xlu0 %1812, %v200_v6  }
  0x20   : > { %1810 = vset.pattern.permute.xlu1 %v1987_v3 }
  0x21   : > { %263 = vperm.xlu1 %1810, %v199_v16  }
  0x23   : > { %1815 = vset.pattern.permute.xlu0 %v3015_v28 }
  0x24   : > { %361 = vperm.xlu0 %1815, %v2124_v27  }
  0x25   : > { %1811 = vset.pattern.permute.xlu1 %v3013_v23 }
  0x26   : > { %321 = vperm.xlu1 %1811, %v201_v1   ;;  %v2257_v1 = vrot.slane %v2078_v15, %v2163_v34 }
  0x28   : > { %1816 = vset.pattern.permute.xlu0 %v1987_v3 }
  0x29   : > { %516 = vperm.xlu0 %1816, %v206_v25  }
  0x2a   : > { %313 = vperm.xlu1 %1811, %v199_v16  }
  0x2d   : > { %504 = vperm.xlu0 %1816, %v203_v30  }
  0x2e   : > { %1813 = vset.pattern.permute.xlu1 %v1988_v4 }
  0x2f   : > { %492 = vperm.xlu1 %1813, %v206_v25  }
  0x31   : > { %1821 = vset.pattern.permute.xlu0 %v3013_v23 }
  0x32   : > { %548 = vperm.xlu0 %1821, %v206_v25  }
  0x33   : > { %487 = vperm.xlu1 %1813, %v205_v26  }
  0x36   : > { %540 = vperm.xlu0 %1821, %v204_v29  }
  0x37   : > { %1814 = vset.pattern.permute.xlu1 %v1987_v3 }
  0x38   : > { %512 = vperm.xlu1 %1814, %v205_v26  }
  0x3a   : > { %1825 = vset.pattern.permute.xlu0 %v1988_v4 }
  0x3c   : > { %1817 = vset.pattern.permute.xlu1 %v1988_v4 }
  0x3d   : > { %482 = vperm.xlu1 %1817, %v204_v29  }
  0x41   : > { %1818 = vset.pattern.permute.xlu1 %v1987_v3 }
  0x42   : > { %508 = vperm.xlu1 %1818, %v204_v29  }
  0x46   : > { %1819 = vset.pattern.permute.xlu1 %v3015_v28 }
  0x47   : > { %356 = vperm.xlu1 %1819, %v2142_v31  }
  0x4b   : > { %1820 = vset.pattern.permute.xlu1 %v1988_v4 }
  0x4c   : > { %477 = vperm.xlu1 %1820, %v203_v30  }
  0x50   : > { %1822 = vset.pattern.permute.xlu1 %v3013_v23 }
  0x51   : > { %544 = vperm.xlu1 %1822, %v205_v26  }
  0x55   : > { %1823 = vset.pattern.permute.xlu1 %v3015_v28 }
  0x56   : > { %351 = vperm.xlu1 %1823, %v2152_v32  }
  0x5a   : > { %346 = vperm.xlu1 %1823, %v2159_v33  }
  0x5e   : > { %1824 = vset.pattern.permute.xlu1 %v3013_v23 }
  0x5f   : > { %536 = vperm.xlu1 %1824, %v203_v30  }
  0x63   : > { %1826 = vset.pattern.permute.xlu1 %v1987_v3 }
  0x88   : > { %v2170_v36 = vpop.permute.xlu1 %227  ;;  %v2172_v37 = vpop.permute.xlu0 %275 }
  0x89   : > { %v737_v48 = vmul.f32 %v2184_v40, %v2170_v36  ;;  %v738_v49 = vmul.f32 %v2188_v41, %v2170_v36  ;;  %v765_v55 = vmul.f32 %v2176_v38, %v2172_v37  ;;  %v766_v56 = vmul.f32 %v2180_v39, %v2172_v37 }
  0x8a   : > { %v1096_v3 = vmul.f32 %v2221_v52, %v2172_v37  ;;  %v1097_v4 = vmul.f32 %v2225_v53, %v2172_v37  ;;  %v1427_v6 = vmul.f32 %v2229_v54, %v2172_v37  ;;  %v1428_v8 = vmul.f32 %v2247_v61, %v2172_v37 }
  0x8c   : > { %v2195_v43 = vpop.permute.xlu0 %267 }
  0x8d   : > { %v2197_v44 = vpop.permute.xlu1 %271  ;;  %v761_v9 = vmul.f32 %v2176_v38, %v2195_v43  ;;  %v1423_v23 = vmul.f32 %v2229_v54, %v2195_v43  ;;  %v1424_v28 = vmul.f32 %v2247_v61, %v2195_v43 }
  0x8e   : > { %v763_v46 = vmul.f32 %v2176_v38, %v2197_v44  ;;  %v764_v47 = vmul.f32 %v2180_v39, %v2197_v44 }
  0x90   : > { %v2237_v58 = vadd.f32 %v763_v46, %v737_v48  ;;  %v2239_v59 = vadd.f32 %v764_v47, %v738_v49  ;;  %v762_v47 = vmul.f32 %v2180_v39, %v2195_v43  ;;  %v1092_v48 = vmul.f32 %v2221_v52, %v2195_v43 }
  0x91   : > { %v2235_v57 = vpop.permute.xlu0 %232  ;;  %v1093_v49 = vmul.f32 %v2225_v53, %v2195_v43 }
  0x92   : > { %v739_v62 = vmul.f32 %v2184_v40, %v2235_v57  ;;  %v740_v63 = vmul.f32 %v2188_v41, %v2235_v57  ;;  %v2253_v0 = vpop.permute.xlu1 %222  ;;  %v1070_v12 = vmul.f32 %v2213_v50, %v2235_v57  ;;  %v1071_v16 = vmul.f32 %v2217_v51, %v2235_v57 }
  0x93   : > { %v1401_v25 = vmul.f32 %v2243_v60, %v2235_v57  ;;  %v1402_v26 = vmul.f32 %v2257_v1, %v2235_v57  ;;  %v735_v2 = vmul.f32 %v2184_v40, %v2253_v0  ;;  %v1067_v21 = vmul.f32 %v2217_v51, %v2253_v0 }
  0x94   : > { %v773_v30 = vadd.f32 %v765_v55, %v739_v62  ;;  %v774_v46 = vadd.f32 %v766_v56, %v740_v63  ;;  %v736_v55 = vmul.f32 %v2188_v41, %v2253_v0  ;;  %v1066_v56 = vmul.f32 %v2213_v50, %v2253_v0 }
  0x95   : > { %v2277_v29 = vpop.permute.xlu0 %217  ;;  %v1104_v22 = vadd.f32 %v1096_v3, %v1070_v12  ;;  %v1105_v15 = vadd.f32 %v1097_v4, %v1071_v16  ;;  %v1397_v45 = vmul.f32 %v2243_v60, %v2253_v0  ;;  %v1435_v20 = vadd.f32 %v1427_v6, %v1401_v25  ;;  %v214_v4 = vld [vmem:[%s2050_s27] sm:$0xf] }
  0x96   : > { %v1436_v14 = vadd.f32 %v1428_v8, %v1402_v26  ;;  %v1398_v19 = vmul.f32 %v2257_v1, %v2253_v0  ;;  %v769_v3 = vadd.f32 %v761_v9, %v735_v2  ;;  %v770_v6 = vadd.f32 %v762_v47, %v736_v55 }
  0x97   : > { %v2295_v62 = vpop.permute.xlu1 %325  ;;  %v1101_v26 = vadd.f32 %v1093_v49, %v1067_v21  ;;  %v2330_v18 = vrot.slane %v214_v4, %v2163_v34  ;;  %v2333_v2 = vrot.slane %v214_v4, %v2043_v7  ;;  %v2339_v9 = vrot.slane %v214_v4, %v2059_v10 }
  0x98   : > { %v2298_v63 = vadd.f32 %v773_v30, %v2295_v62  ;;  %v2301_v24 = vadd.f32 %v774_v46, %v2295_v62  ;;  %v2310_v42 = vadd.f32 %v1104_v22, %v2295_v62  ;;  %v2313_v30 = vadd.f32 %v1105_v15, %v2295_v62 }
  0x99   : > { %v2319_v12 = vadd.f32 %v1435_v20, %v2295_v62  ;;  %v2322_v16 = vadd.f32 %v1436_v14, %v2295_v62  ;;  %v1100_v22 = vadd.f32 %v1092_v48, %v1066_v56  ;;  %v1431_v15 = vadd.f32 %v1423_v23, %v1397_v45 }
  0x9a   : > { %3048 = vst [vmem:[#allocation16_spill] sm:$0xff] %v2310_v42  ;;  %3049 = vst [vmem:[#allocation17_spill] sm:$0xff] %v2313_v30  ;;  %v2315_v46 = vpop.permute.xlu0 %317  ;;  %v1432_v14 = vadd.f32 %v1424_v28, %v1398_v19  ;;  %v1094_v7 = vmul.f32 %v2221_v52, %v2197_v44  ;;  %v1095_v23 = vmul.f32 %v2225_v53, %v2197_v44 }
  0x9b   : > { %3050 = vst [vmem:[#allocation18_spill] sm:$0xff] %v2319_v12  ;;  %3051 = vst [vmem:[#allocation19_spill] sm:$0xff] %v2322_v16  ;;  %v2325_v8 = vadd.f32 %v769_v3, %v2315_v46  ;;  %v2336_v20 = vadd.f32 %v770_v6, %v2315_v46  ;;  %v2342_v47 = vadd.f32 %v1100_v22, %v2315_v46 }
  0x9c   : > { %v2327_v25 = vpop.permute.xlu1 %263  ;;  %v2345_v48 = vadd.f32 %v1101_v26, %v2315_v46  ;;  %v2348_v21 = vadd.f32 %v1431_v15, %v2315_v46  ;;  %v1425_v19 = vmul.f32 %v2229_v54, %v2197_v44  ;;  %v2357_v28 = vadd.f32 %v1432_v14, %v2315_v46 }
  0x9d   : > { %3052 = vst [vmem:[#allocation20_spill] sm:$0xff] %v2342_v47  ;;  %v1068_v45 = vmul.f32 %v2213_v50, %v2170_v36  ;;  %v1069_v49 = vmul.f32 %v2217_v51, %v2170_v36  ;;  %v2364_v55 = vrot.slane %v214_v4, %v2069_v13  ;;  %v1426_v56 = vmul.f32 %v2247_v61, %v2197_v44 }
  0x9e   : > { %3053 = vst [vmem:[#allocation21_spill] sm:$0xff] %v2345_v48  ;;  %3054 = vst [vmem:[#allocation22_spill] sm:$0xff] %v2348_v21  ;;  %v1399_v6 = vmul.f32 %v2243_v60, %v2170_v36  ;;  %v1400_v22 = vmul.f32 %v2257_v1, %v2170_v36  ;;  %v733_v26 = vmul.f32 %v2184_v40, %v2277_v29 }
  0x9f   : > { %3055 = vst [vmem:[#allocation23_spill] sm:$0xff] %v2357_v28  ;;  %3056 = vst [vmem:[#allocation24_spill] sm:$0xff] %v2364_v55  ;;  %v734_v15 = vmul.f32 %v2188_v41, %v2277_v29  ;;  %v759_v13 = vmul.f32 %v2176_v38, %v2327_v25  ;;  %v760_v4 = vmul.f32 %v2180_v39, %v2327_v25 }
  0xa0   : > { %v1090_v28 = vmul.f32 %v2221_v52, %v2327_v25  ;;  %v1102_v12 = vadd.f32 %v1094_v7, %v1068_v45  ;;  %v1103_v16 = vadd.f32 %v1095_v23, %v1069_v49  ;;  %v1433_v11 = vadd.f32 %v1425_v19, %v1399_v6 }
  0xa1   : > { %v322_v3 = vpop.permute.xlu1 %321  ;;  %v1091_v17 = vmul.f32 %v2225_v53, %v2327_v25  ;;  %v1421_v35 = vmul.f32 %v2229_v54, %v2327_v25  ;;  %v1422_v47 = vmul.f32 %v2247_v61, %v2327_v25  ;;  %v1065_v23 = vmul.f32 %v2217_v51, %v2277_v29 }
  0xa2   : > { %v2381_v14 = vadd.f32 %v2237_v58, %v322_v3  ;;  %v2384_v21 = vadd.f32 %v2239_v59, %v322_v3  ;;  %v1434_v58 = vadd.f32 %v1426_v56, %v1400_v22  ;;  %v1064_v59 = vmul.f32 %v2213_v50, %v2277_v29 }
  0xa3   : > { %v2396_v48 = vadd.f32 %v1102_v12, %v322_v3  ;;  %v2398_v42 = vadd.f32 %v1103_v16, %v322_v3  ;;  %v2400_v7 = vadd.f32 %v1433_v11, %v322_v3  ;;  %v1395_v19 = vmul.f32 %v2243_v60, %v2277_v29 }
  0xa4   : > { %v1396_v45 = vmul.f32 %v2257_v1, %v2277_v29  ;;  %v2408_v49 = vadd.f32 %v1434_v58, %v322_v3  ;;  %v2412_v12 = vrot.slane %v2339_v9, %v2059_v10  ;;  %v767_v16 = vadd.f32 %v759_v13, %v733_v26 }
  0xa5   : > { %3057 = vst [vmem:[#allocation25_spill] sm:$0xff] %v2396_v48  ;;  %3058 = vst [vmem:[#allocation26_spill] sm:$0xff] %v2398_v42  ;;  %v314_v56 = vpop.permute.xlu1 %313  ;;  %v768_v6 = vadd.f32 %v760_v4, %v734_v15  ;;  %v1098_v11 = vadd.f32 %v1090_v28, %v1064_v59  ;;  %v2416_v22 = vrot.slane %v2364_v55, %v2059_v10 }
  0xa6   : > { %3059 = vst [vmem:[#allocation27_spill] sm:$0xff] %v2400_v7  ;;  %3060 = vst [vmem:[#allocation28_spill] sm:$0xff] %v2408_v49  ;;  %v1099_v7 = vadd.f32 %v1091_v17, %v1065_v23  ;;  %v1429_v48 = vadd.f32 %v1421_v35, %v1395_v19  ;;  %v1430_v42 = vadd.f32 %v1422_v47, %v1396_v45 }
  0xa7   : > { %v2420_v30 = vrot.slane %v2330_v18, %v2163_v34  ;;  %v2422_v58 = vadd.f32 %v767_v16, %v314_v56  ;;  %v2424_v49 = vadd.f32 %v768_v6, %v314_v56  ;;  %v2426_v5 = vadd.f32 %v1098_v11, %v314_v56 }
  0xa8   : > { %v2430_v28 = vrot.slane %v2333_v2, %v2163_v34  ;;  %v2432_v26 = vadd.f32 %v1099_v7, %v314_v56  ;;  %v2434_v10 = vadd.f32 %v1429_v48, %v314_v56  ;;  %v2436_v17 = vadd.f32 %v1430_v42, %v314_v56 }
  0xa9   : > { %3061 = vst [vmem:[#allocation29_spill] sm:$0xff] %v2426_v5  ;;  %v300_v35 = vmul.f32 %v2412_v12, %v2197_v44  ;;  %v301_v47 = vmul.f32 %v2416_v22, %v2197_v44  ;;  %v258_v15 = vmul.f32 %v2420_v30, %v2170_v36  ;;  %v303_v4 = vmul.f32 %v2416_v22, %v2172_v37 }
  0xaa   : > { %3062 = vst [vmem:[#allocation30_spill] sm:$0xff] %v2432_v26  ;;  %3063 = vst [vmem:[#allocation31_spill] sm:$0xff] %v2434_v10  ;;  %v261_v13 = vmul.f32 %v2430_v28, %v2235_v57  ;;  %v259_v48 = vmul.f32 %v2430_v28, %v2170_v36  ;;  %v260_v42 = vmul.f32 %v2420_v30, %v2235_v57 }
  0xab   : > { %3064 = vst [vmem:[#allocation32_spill] sm:$0xff] %v2436_v17  ;;  %v302_v59 = vmul.f32 %v2412_v12, %v2172_v37  ;;  %v298_v44 = vmul.f32 %v2412_v12, %v2195_v43  ;;  %v256_v7 = vmul.f32 %v2420_v30, %v2253_v0  ;;  %v308_v23 = vadd.f32 %v300_v35, %v258_v15 }
  0xac   : > { %v299_v19 = vmul.f32 %v2416_v22, %v2195_v43  ;;  %v257_v45 = vmul.f32 %v2430_v28, %v2253_v0  ;;  %v309_v36 = vadd.f32 %v301_v47, %v259_v48  ;;  %v297_v57 = vmul.f32 %v2416_v22, %v2327_v25 }
  0xad   : > { %v332_v16 = vadd.f32 %v322_v3, %v308_v23  ;;  %v311_v6 = vadd.f32 %v303_v4, %v261_v13  ;;  %v296_v37 = vmul.f32 %v2412_v12, %v2327_v25  ;;  %v310_v10 = vadd.f32 %v302_v59, %v260_v42 }
  0xae   : > { %v333_v11 = vadd.f32 %v322_v3, %v309_v36  ;;  %v255_v35 = vmul.f32 %v2430_v28, %v2277_v29  ;;  %v306_v15 = vadd.f32 %v298_v44, %v256_v7  ;;  %v254_v0 = vmul.f32 %v2420_v30, %v2277_v29 }
  0xaf   : > { %v335_v43 = vadd.f32 %v2295_v62, %v311_v6  ;;  %v307_v47 = vadd.f32 %v299_v19, %v257_v45  ;;  %v334_v48 = vadd.f32 %v2295_v62, %v310_v10  ;;  %1831 = vtanh.f32 %v332_v16  ;;  %v2480_v45 = vpop.permute.xlu1 %492 }
  0xb0   : > { %v330_v23 = vadd.f32 %v2315_v46, %v306_v15  ;;  %v305_v13 = vadd.f32 %v297_v57, %v255_v35  ;;  %1833 = vtanh.f32 %v333_v11  ;;  %v304_v3 = vadd.f32 %v296_v37, %v254_v0  ;;  %v2496_v37 = vpop.permute.xlu0 %361 }
  0xb1   : > { %v331_v25 = vadd.f32 %v2315_v46, %v307_v47  ;;  %1835 = vtanh.f32 %v335_v43 }
  0xb2   : > { %v329_v4 = vadd.f32 %v314_v56, %v305_v13  ;;  %v328_v42 = vadd.f32 %v314_v56, %v304_v3  ;;  %1837 = vtanh.f32 %v334_v48  ;;  %v3065_v56 = vmov 0.0  }
  0xb3   : > { %1839 = vtanh.f32 %v330_v23  ;;  %v2487_v36 = vpop.permute.xlu1 %487  ;;  %v892_v3 = vmul.f32 %v2184_v40, %v2480_v45 }
  0xb4   : > { %1841 = vtanh.f32 %v331_v25  ;;  %v2500_v35 = vpop.permute.xlu0 %516  ;;  %v890_v0 = vmul.f32 %v2184_v40, %v2487_v36  ;;  %v891_v23 = vmul.f32 %v2188_v41, %v2487_v36  ;;  %v1552_v26 = vmul.f32 %v2243_v60, %v2487_v36 }
  0xb5   : > { %1843 = vtanh.f32 %v329_v4  ;;  %v1232_v17 = vmul.f32 %v2225_v53, %v2500_v35 }
  0xb6   : > { %1845 = vtanh.f32 %v328_v42  ;;  %v900_v42 = vmul.f32 %v2176_v38, %v2500_v35 }
  0xb7   : > { %v2490_v57 = vpop.permute.xlu1 %512 }
  0xb8   : > { %v2504_v43 = vpop.permute.xlu0 %504  ;;  %v898_v47 = vmul.f32 %v2176_v38, %v2490_v57  ;;  %v899_v13 = vmul.f32 %v2180_v39, %v2490_v57 }
  0xba   : > { %v906_v25 = vadd.f32 %v898_v47, %v890_v0  ;;  %v907_v4 = vadd.f32 %v899_v13, %v891_v23  ;;  %v1222_v0 = vmul.f32 %v2217_v51, %v2487_v36  ;;  %v1230_v23 = vmul.f32 %v2225_v53, %v2490_v57 }
  0xbb   : > { %v2492_v16 = vpop.permute.xlu1 %482  ;;  %v1223_v13 = vmul.f32 %v2213_v50, %v2480_v45 }
  0xbc   : > { %v1832_v29 = vpop.eup %1831 }
  0xbd   : > { %v1834_v59 = vpop.eup %1833 }
  0xbe   : > { %v1836_v44 = vpop.eup %1835 }
  0xbf   : > { %v1838_v62 = vpop.eup %1837  ;;  %404 = vmatprep.subr.mxu0 %v1836_v44  ;;  %v2494_v6 = vpop.permute.xlu1 %508  ;;  %v893_v44 = vmul.f32 %v2188_v41, %v2480_v45 }
  0xc0   : > { %v1840_v10 = vpop.eup %1839  ;;  %405 = vmatpush1.msra.mxu0 %v1838_v62  ;;  %v901_v62 = vmul.f32 %v2180_v39, %v2500_v35 }
  0xc1   : > { %v1842_v7 = vpop.eup %1841  ;;  %406 = vmatprep.subr.mxu0 %v1834_v59 }
  0xc2   : > { %v1844_v46 = vpop.eup %1843  ;;  %407 = vmatpush1.msra.mxu0 %v1832_v29  ;;  %v2520_v29 = vpop.permute.xlu0 %548  ;;  %v909_v47 = vadd.f32 %v901_v62, %v893_v44  ;;  %v1238_v62 = vadd.f32 %v1230_v23, %v1222_v0  ;;  %v888_v23 = vmul.f32 %v2184_v40, %v2492_v16 }
  0xc3   : > { %v1846_v19 = vpop.eup %1845  ;;  %408 = vmatprep.subr.mxu0 %v1842_v7  ;;  %v2498_v11 = vpop.permute.xlu1 %356 }
  0xc4   : > { %409 = vmatpush1.msra.mxu0 %v1840_v10  ;;  %v1221_v10 = vmul.f32 %v2213_v50, %v2487_v36  ;;  %v2552_v44 = vadd.f32 %v909_v47, %v2520_v29 }
  0xc5   : > { %410 = vmatprep.subr.mxu0 %v1844_v46  ;;  %v908_v46 = vadd.f32 %v900_v42, %v892_v3  ;;  %v1224_v42 = vmul.f32 %v2217_v51, %v2480_v45 }
  0xc6   : > { %411 = vmatpush1.msra.mxu0 %v1846_v19  ;;  %v1229_v19 = vmul.f32 %v2221_v52, %v2490_v57  ;;  %3069 = vst [vmem:[#allocation36_spill] sm:$0xff] %v2552_v44 }
  0xc7   : > { %1764 = vmatmul.mubr.msk.f32.vlgmr.msra.gmra.mxu0 %vm369_vm0, %v2159_v33  ;;  %v2502_v15 = vpop.permute.xlu1 %477 }
  0xc8   : > { %450 = vmatprep.mubr.f32.mxu0 %v3065_v56  ;;  %v1237_v3 = vadd.f32 %v1229_v19, %v1221_v10  ;;  %v1560_v10 = vmul.f32 %v2229_v54, %v2490_v57 }
  0xca   : > { %v1568_v0 = vadd.f32 %v1560_v10, %v1552_v26  ;;  %v1553_v26 = vmul.f32 %v2257_v1, %v2487_v36  ;;  %v1220_v10 = vmul.f32 %v2217_v51, %v2492_v16 }
  0xcb   : > { %1765 = vmatmul.mubr.msk.f32.gmra.mxu0 %vm369_vm0, %v2152_v32 }
  0xcc   : > { %456 = vmatprep.mubr.f32.mxu0 %v3065_v56  ;;  %v2510_v48 = vpop.permute.xlu1 %544 }
  0xcd   : > { %v2523_v59 = vadd.f32 %v906_v25, %v2510_v48  ;;  %v2532_v7 = vadd.f32 %v907_v4, %v2510_v48  ;;  %v1231_v25 = vmul.f32 %v2221_v52, %v2500_v35  ;;  %v2545_v4 = vadd.f32 %v908_v46, %v2520_v29 }
  0xce   : > { %v1240_v46 = vadd.f32 %v1232_v17, %v1224_v42  ;;  %v2562_v19 = vadd.f32 %v1238_v62, %v2510_v48  ;;  %v889_v17 = vmul.f32 %v2188_v41, %v2492_v16  ;;  %v1561_v42 = vmul.f32 %v2247_v61, %v2490_v57 }
  0xcf   : > { %1766 = vmatmul.mubr.msk.f32.gmra.mxu0 %vm369_vm0, %v2142_v31  ;;  %3066 = vst [vmem:[#allocation33_spill] sm:$0xff] %v2523_v59  ;;  %3067 = vst [vmem:[#allocation34_spill] sm:$0xff] %v2532_v7  ;;  %v1239_v5 = vadd.f32 %v1231_v25, %v1223_v13  ;;  %v2557_v59 = vadd.f32 %v1237_v3, %v2510_v48  ;;  %v896_v13 = vmul.f32 %v2176_v38, %v2494_v6 }
  0xd0   : > { %462 = vmatprep.mubr.f32.mxu0 %v3065_v56  ;;  %3068 = vst [vmem:[#allocation35_spill] sm:$0xff] %v2545_v4  ;;  %3071 = vst [vmem:[#allocation38_spill] sm:$0xff] %v2562_v19  ;;  %v2568_v47 = vadd.f32 %v1240_v46, %v2520_v29  ;;  %v897_v25 = vmul.f32 %v2180_v39, %v2494_v6  ;;  %v1227_v3 = vmul.f32 %v2221_v52, %v2494_v6 }
  0xd1   : > { %3070 = vst [vmem:[#allocation37_spill] sm:$0xff] %v2557_v59  ;;  %v2565_v7 = vadd.f32 %v1239_v5, %v2520_v29  ;;  %v1219_v5 = vmul.f32 %v2213_v50, %v2492_v16  ;;  %v2586_v62 = vadd.f32 %v896_v13, %v888_v23  ;;  %v1228_v59 = vmul.f32 %v2225_v53, %v2494_v6 }
  0xd2   : > { %3073 = vst [vmem:[#allocation40_spill] sm:$0xff] %v2568_v47  ;;  %v2588_v46 = vadd.f32 %v897_v25, %v889_v17  ;;  %v1550_v19 = vmul.f32 %v2243_v60, %v2492_v16  ;;  %v1562_v23 = vmul.f32 %v2229_v54, %v2500_v35  ;;  %v1558_v17 = vmul.f32 %v2229_v54, %v2494_v6 }
  0xd3   : > { %1767 = vmatmul.mubr.msk.f32.gmra.mxu0 %vm369_vm0, %v2124_v27  ;;  %3072 = vst [vmem:[#allocation39_spill] sm:$0xff] %v2565_v7  ;;  %3074 = vst [vmem:[#allocation41_spill] sm:$0xff] %v2586_v62  ;;  %v2594_v47 = vadd.f32 %v1227_v3, %v1219_v5  ;;  %v1554_v7 = vmul.f32 %v2243_v60, %v2480_v45  ;;  %v2602_v13 = vadd.f32 %v1228_v59, %v1220_v10 }
  0xd4   : > { %468 = vmatprep.mubr.f32.mxu0 %v3065_v56  ;;  %3075 = vst [vmem:[#allocation42_spill] sm:$0xff] %v2588_v46  ;;  %v1551_v25 = vmul.f32 %v2257_v1, %v2492_v16  ;;  %v1555_v5 = vmul.f32 %v2257_v1, %v2480_v45  ;;  %v1559_v3 = vmul.f32 %v2247_v61, %v2494_v6 }
  0xd5   : > { %3076 = vst [vmem:[#allocation43_spill] sm:$0xff] %v2594_v47  ;;  %3077 = vst [vmem:[#allocation44_spill] sm:$0xff] %v2602_v13  ;;  %v2613_v47 = vadd.f32 %v1568_v0, %v2510_v48  ;;  %v1569_v62 = vadd.f32 %v1561_v42, %v1553_v26  ;;  %v2615_v44 = vadd.f32 %v1558_v17, %v1550_v19 }
  0xd6   : > { %v1570_v59 = vadd.f32 %v1562_v23, %v1554_v7  ;;  %v1563_v10 = vmul.f32 %v2247_v61, %v2500_v35  ;;  %v2619_v13 = vadd.f32 %v1559_v3, %v1551_v25  ;;  %v886_v19 = vmul.f32 %v2184_v40, %v2502_v15 }
  0xd7   : > { %3078 = vst [vmem:[#allocation45_spill] sm:$0xff] %v2613_v47  ;;  %3079 = vst [vmem:[#allocation46_spill] sm:$0xff] %v2615_v44  ;;  %v2622_v46 = vadd.f32 %v1569_v62, %v2510_v48  ;;  %v894_v7 = vmul.f32 %v2176_v38, %v2504_v43  ;;  %v887_v0 = vmul.f32 %v2188_v41, %v2502_v15 }
  0xd8   : > { %3080 = vst [vmem:[#allocation47_spill] sm:$0xff] %v2619_v13  ;;  %v2625_v4 = vadd.f32 %v1570_v59, %v2520_v29  ;;  %v1571_v34 = vadd.f32 %v1563_v10, %v1555_v5  ;;  %v895_v26 = vmul.f32 %v2180_v39, %v2504_v43  ;;  %v1217_v42 = vmul.f32 %v2213_v50, %v2502_v15  ;;  %v2688_v10 = vpop.permute.xlu1 %351 }
  0xd9   : > { %3081 = vst [vmem:[#allocation48_spill] sm:$0xff] %v2622_v46  ;;  %v1225_v62 = vmul.f32 %v2221_v52, %v2504_v43  ;;  %v1226_v40 = vmul.f32 %v2225_v53, %v2504_v43  ;;  %v2646_v23 = vadd.f32 %v894_v7, %v886_v19  ;;  %v1548_v41 = vmul.f32 %v2243_v60, %v2502_v15  ;;  %v2669_v60 = vld [vmem:[%s3009_s2 + $0x20] sm:$0x1] }
  0xda   : > { %3082 = vst [vmem:[#allocation49_spill] sm:$0xff] %v2625_v4  ;;  %v2628_v55 = vadd.f32 %v1571_v34, %v2520_v29  ;;  %v1218_v34 = vmul.f32 %v2217_v51, %v2502_v15  ;;  %v2648_v38 = vadd.f32 %v895_v26, %v887_v0  ;;  %v1556_v39 = vmul.f32 %v2229_v54, %v2504_v43  ;;  %v207_v54 = vld [vmem:[%s3008_s1 + $0x40] sm:$0x1] }
  0xdb   : > { %v2654_v50 = vadd.f32 %v1225_v62, %v1217_v42  ;;  %v1549_v51 = vmul.f32 %v2257_v1, %v2502_v15  ;;  %v1557_v52 = vmul.f32 %v2247_v61, %v2504_v43  ;;  %1768 = vmatmul.mubr.msk.f32.gmra.mxu0 %vm369_vm0, %v2669_v60  ;;  %665 = vperm.xlu1 %1826, %v207_v54   ;;  %v2680_v61 = vld [vmem:[%s3010_s3] sm:$0x1]  ;;  %v3086_v1 = vmov 32  }
  0xdc   : > { %3083 = vst [vmem:[#allocation50_spill] sm:$0xff] %v2628_v55  ;;  %v2656_v17 = vadd.f32 %v1226_v40, %v1218_v34  ;;  %v2662_v53 = vadd.f32 %v1556_v39, %v1548_v41  ;;  %998 = vmatprep.mubr.f32.mxu0 %v3065_v56  ;;  %659 = vperm.xlu0 %1825, %v207_v54   ;;  %v3087_v5 = vmov 2  }
  0xdd   : > { %v2664_v25 = vadd.f32 %v1557_v52, %v1549_v51  ;;  %v501_v7 = vmul.f32 %v2480_v45, %v2420_v30  ;;  %v525_v0 = vmul.f32 %v2500_v35, %v2412_v12  ;;  %v500_v42 = vmul.f32 %v2487_v36, %v2430_v28 }
  0xde   : > { %3084 = vst [vmem:[#allocation51_spill] sm:$0xff] %v2662_v53  ;;  %v524_v62 = vmul.f32 %v2490_v57, %v2416_v22  ;;  %v502_v34 = vmul.f32 %v2480_v45, %v2430_v28  ;;  %v526_v40 = vmul.f32 %v2500_v35, %v2416_v22  ;;  %v498_v41 = vmul.f32 %v2492_v16, %v2430_v28 }
  0xdf   : > { %3085 = vst [vmem:[#allocation52_spill] sm:$0xff] %v2664_v25  ;;  %1827 = vset.pattern.permute.xlu1 %v3086_v1  ;;  %v522_v39 = vmul.f32 %v2494_v6, %v2416_v22  ;;  %v499_v52 = vmul.f32 %v2487_v36, %v2420_v30  ;;  %v496_v45 = vmul.f32 %v2502_v15, %v2430_v28 }
  0xe0   : > { %1828 = vset.pattern.permute.xlu0 %v3086_v1  ;;  %366 = vperm.xlu1 %1827, %v2669_v60   ;;  %v2710_v1 = vpop.permute.xlu1 %346  ;;  %v520_v35 = vmul.f32 %v2504_v43, %v2416_v22  ;;  %v495_v53 = vmul.f32 %v2502_v15, %v2420_v30  ;;  %v519_v25 = vmul.f32 %v2504_v43, %v2412_v12  ;;  %v2724_v22 = vpop.permute.xlu0 %540 }
  0xe1   : > { %577 = vperm.xlu0 %1828, %v2680_v61   ;;  %v497_v36 = vmul.f32 %v2492_v16, %v2420_v30  ;;  %v532_v44 = vadd.f32 %v524_v62, %v500_v42  ;;  %v534_v55 = vadd.f32 %v526_v40, %v502_v34  ;;  %v530_v28 = vadd.f32 %v522_v39, %v498_v41 }
  0xe2   : > { %v527_v43 = vadd.f32 %v519_v25, %v495_v53 }
  0xe3   : > { %v556_v62 = vadd.f32 %v2510_v48, %v532_v44  ;;  %v558_v40 = vadd.f32 %v2520_v29, %v534_v55 }
  0xe4   : > { %1829 = vset.pattern.permute.xlu1 %v3087_v5 }
  0xe5   : > { %1830 = vset.pattern.permute.xlu0 %v3087_v5  ;;  %673 = vperm.xlu1 %1829, %v207_v54   ;;  %v523_v54 = vmul.f32 %v2490_v57, %v2412_v12  ;;  %v533_v5 = vadd.f32 %v525_v0, %v501_v7  ;;  %v521_v57 = vmul.f32 %v2494_v6, %v2412_v12  ;;  %v2730_v6 = vpop.permute.xlu1 %536 }
  0xe6   : > { %v528_v7 = vadd.f32 %v520_v35, %v496_v45  ;;  %v551_v44 = vadd.f32 %v2730_v6, %v527_v43 }
  0xe7   : > { %v531_v46 = vadd.f32 %v523_v54, %v499_v52  ;;  %v529_v4 = vadd.f32 %v521_v57, %v497_v36  ;;  %v557_v16 = vadd.f32 %v2520_v29, %v533_v5 }
  0xe8   : > { %v552_v39 = vadd.f32 %v2730_v6, %v528_v7 }
  0xe9   : > { %v555_v53 = vadd.f32 %v2510_v48, %v531_v46  ;;  %v553_v54 = vadd.f32 %v2724_v22, %v529_v4 }
 0x187   : > { %v446_v3 = vpop.f32.mrf.mxu0 }
 0x189   : > { %v448_v59 = vpop.f32.mrf.mxu0 }
 0x18a   : > { %v449_v41 = vadd.f32 %v448_v59, %v2710_v1 }
 0x18b   : > { %v452_v19 = vpop.f32.mrf.mxu0 }
 0x18c   : > { %v560_v45 = vadd.f32 %v552_v39, %v449_v41 }
 0x18d   : > { %v454_v26 = vpop.f32.mrf.mxu0 }
 0x18e   : > { %v455_v42 = vadd.f32 %v454_v26, %v2688_v10  ;;  %v447_v26 = vadd.f32 %v446_v3, %v2710_v1 }
 0x18f   : > { %v458_v51 = vpop.f32.mrf.mxu0 }
 0x190   : > { %v459_v30 = vadd.f32 %v458_v51, %v2498_v11  ;;  %v559_v48 = vadd.f32 %v551_v44, %v447_v26 }
 0x191   : > { %v460_v47 = vpop.f32.mrf.mxu0 }
 0x192   : > { %v461_v15 = vadd.f32 %v460_v47, %v2498_v11  ;;  %v453_v47 = vadd.f32 %v452_v19, %v2688_v10  ;;  %v563_v55 = vadd.f32 %v555_v53, %v459_v30 }
 0x193   : > { %v464_v13 = vpop.f32.mrf.mxu0 }
 0x194   : > { %v465_v0 = vadd.f32 %v464_v13, %v2496_v37  ;;  %v554_v13 = vadd.f32 %v2724_v22, %v530_v28  ;;  %v564_v51 = vadd.f32 %v556_v62, %v461_v15  ;;  %v561_v19 = vadd.f32 %v553_v54, %v453_v47  ;;  %v3088_v15 = vld [vmem:[#allocation24_spill] sm:$0xff] }
 0x195   : > { %v466_v12 = vpop.f32.mrf.mxu0 }
 0x196   : > { %v467_v34 = vadd.f32 %v466_v12, %v2496_v37  ;;  %v565_v25 = vadd.f32 %v557_v16, %v465_v0  ;;  %v562_v29 = vadd.f32 %v554_v13, %v455_v42 }
 0x198   : > { %v566_v52 = vadd.f32 %v558_v40, %v467_v34  ;;  %v3089_v40 = vld [vmem:[#allocation12_spill] sm:$0xff] }
 0x19a   : > { %1847 = vtanh.f32 %v566_v52 }
 0x19b   : > { %1849 = vtanh.f32 %v565_v25  ;;  %v470_v43 = vpop.f32.mrf.mxu0 }
 0x19c   : > { %1851 = vtanh.f32 %v564_v51 }
 0x19d   : > { %1853 = vtanh.f32 %v563_v55  ;;  %v472_v62 = vpop.f32.mrf.mxu0 }
 0x19e   : > { %1855 = vtanh.f32 %v562_v29 }
 0x19f   : > { %1857 = vtanh.f32 %v561_v19 }
 0x1a0   : > { %1859 = vtanh.f32 %v560_v45 }
 0x1a1   : > { %1861 = vtanh.f32 %v559_v48 }
 0x1a2   : > { %1863 = vtanh.f32 %v2301_v24 }
 0x1a3   : > { %1865 = vtanh.f32 %v2298_v63 }
 0x1a4   : > { %1867 = vtanh.f32 %v2384_v21 }
 0x1a5   : > { %1869 = vtanh.f32 %v2381_v14 }
 0x1a6   : > { %1871 = vtanh.f32 %v2336_v20 }
 0x1a7   : > { %v1848_v4 = vpop.eup %1847  ;;  %1873 = vtanh.f32 %v2325_v8 }
 0x1a8   : > { %v1850_v46 = vpop.eup %1849  ;;  %1875 = vtanh.f32 %v2424_v49  ;;  %610 = vmatprep.subr.mxu1 %v1848_v4  ;;  %v1992_v4 = vmov 1966171168  }
 0x1a9   : > { %v1852_v3 = vpop.eup %1851  ;;  %1877 = vtanh.f32 %v2422_v58  ;;  %611 = vmatpush1.msra.mxu1 %v1850_v46  ;;  %v694_v46 = vunpack.c.l.s4 %v1992_v4  ;;  %v3103_v4 = vld [vmem:[#allocation25_spill] sm:$0xff] }
 0x1aa   : > { %v1854_v24 = vpop.eup %1853  ;;  %612 = vmatprep.subr.mxu1 %v1852_v3 }
 0x1ab   : > { %v1856_v63 = vpop.eup %1855  ;;  %613 = vmatpush1.msra.mxu1 %v1854_v24 }
 0x1ac   : > { %v1858_v21 = vpop.eup %1857  ;;  %614 = vmatprep.subr.mxu1 %v1856_v63 }
 0x1ad   : > { %v1860_v14 = vpop.eup %1859  ;;  %615 = vmatpush1.msra.mxu1 %v1858_v21 }
 0x1ae   : > { %v1862_v20 = vpop.eup %1861  ;;  %616 = vmatprep.subr.mxu1 %v1860_v14  ;;  %v695_v14 = vunpack.c.0.s8 %v694_v46  ;;  %v3104_v46 = vld [vmem:[#allocation21_spill] sm:$0xff] }
 0x1af   : > { %v1864_v59 = vpop.eup %1863  ;;  %617 = vmatpush1.msra.mxu1 %v1862_v20 }
 0x1b0   : > { %v1866_v8 = vpop.eup %1865  ;;  %1769 = vmatmul.mubr.msk.f32.vlgmr.msra.gmra.mxu1 %vm369_vm0, %v2680_v61  ;;  %815 = vmatprep.subr.mxu1 %v1864_v59 }
 0x1b1   : > { %v1868_v49 = vpop.eup %1867  ;;  %816 = vmatpush1.msra.mxu1 %v1866_v8  ;;  %855 = vmatprep.mubr.f32.mxu1 %v3065_v56 }
 0x1b2   : > { %v1870_v58 = vpop.eup %1869  ;;  %817 = vmatprep.subr.mxu1 %v1868_v49 }
 0x1b3   : > { %v1872_v35 = vpop.eup %1871  ;;  %818 = vmatpush1.msra.mxu1 %v1870_v58 }
 0x1b4   : > { %v1874_v5 = vpop.eup %1873  ;;  %819 = vmatprep.subr.mxu1 %v1872_v35 }
 0x1b5   : > { %v1876_v36 = vpop.eup %1875  ;;  %820 = vmatpush1.msra.mxu1 %v1874_v5 }
 0x1b6   : > { %v1878_v57 = vpop.eup %1877  ;;  %821 = vmatprep.subr.mxu1 %v1876_v36 }
 0x1b7   : > { %822 = vmatpush1.msra.mxu1 %v1878_v57 }
 0x1b8   : > { %1770 = vmatmul.mubr.msk.f32.vlgmr.msra.gmra.mxu1 %vm369_vm0, %v2159_v33  ;;  %v2770_v33 = vpop.permute.xlu1 %665 }
 0x1b9   : > { %861 = vmatprep.mubr.f32.mxu1 %v3065_v56  ;;  %v668_v7 = vmul.f32 %v2770_v33, %v2339_v9  ;;  %v669_v0 = vmul.f32 %v2770_v33, %v3088_v15 }
 0x1bc   : > { %1771 = vmatmul.mubr.msk.f32.gmra.mxu1 %vm369_vm0, %v2152_v32  ;;  %v2772_v32 = vpop.permute.xlu0 %659  ;;  %v2774_v28 = vpop.permute.xlu1 %366 }
 0x1bd   : > { %867 = vmatprep.mubr.f32.mxu1 %v3065_v56  ;;  %v471_v34 = vadd.f32 %v470_v43, %v2774_v28  ;;  %v473_v9 = vadd.f32 %v472_v62, %v2774_v28  ;;  %v3093_v62 = vld [vmem:[#allocation34_spill] sm:$0xff] }
 0x1c0   : > { %1772 = vmatmul.mubr.msk.f32.gmra.mxu1 %vm369_vm0, %v2142_v31  ;;  %v662_v31 = vmul.f32 %v2772_v32, %v2330_v18  ;;  %v2784_v16 = vpop.permute.xlu1 %673  ;;  %v578_v42 = vpop.permute.xlu0 %577 }
 0x1c1   : > { %873 = vmatprep.mubr.f32.mxu1 %v3065_v56  ;;  %v2789_v47 = vrot.slane %v578_v42, %v3089_v40 }
 0x1c2   : > { %v670_v30 = vadd.f32 %v668_v7, %v662_v31  ;;  %v3090_v7 = vld [vmem:[#allocation2_spill] sm:$0xff] }
 0x1c4   : > { %1773 = vmatmul.mubr.msk.f32.gmra.mxu1 %vm369_vm0, %v2124_v27  ;;  %v663_v27 = vmul.f32 %v2772_v32, %v2333_v2  ;;  %v676_v18 = vadd.f32 %v2784_v16, %v670_v30 }
 0x1c5   : > { %879 = vmatprep.mubr.f32.mxu1 %v3065_v56 }
 0x1c6   : > { %v671_v12 = vadd.f32 %v669_v0, %v663_v27  ;;  %v678_v13 = vadd.f32 %v676_v18, %v471_v34  ;;  %v2801_v27 = vsub.s32 %v695_v14, %v3090_v7  ;;  %v3091_v0 = vld [vmem:[#allocation35_spill] sm:$0xff]  ;;  %v3094_v18 = vld [vmem:[#allocation36_spill] sm:$0xff] }
 0x1c8   : > { %1774 = vmatmul.mubr.msk.f32.gmra.mxu1 %vm369_vm0, %v2669_v60  ;;  %v677_v2 = vadd.f32 %v2784_v16, %v671_v12  ;;  %v3092_v12 = vld [vmem:[#allocation42_spill] sm:$0xff] }
 0x1c9   : > { %1329 = vmatprep.mubr.f32.mxu1 %v3065_v56  ;;  %v913_v42 = vadd.f32 %v3092_v12, %v2724_v22  ;;  %v2856_v12 = vld [vmem:[%s3009_s2 + $0x8] sm:$0xff] }
 0x1ca   : > { %v679_v25 = vadd.f32 %v677_v2, %v473_v9 }
 0x270   : > { %v652_v53 = vpop.f32.mrf.mxu1 }
 0x271   : > { %v653_v41 = vadd.f32 %v652_v53, %v2789_v47 }
 0x272   : > { %v654_v39 = vpop.f32.mrf.mxu1 }
 0x273   : > { %v680_v51 = vadd.f32 %v678_v13, %v653_v41  ;;  %v655_v52 = vadd.f32 %v654_v39, %v2789_v47  ;;  %v3095_v13 = vld [vmem:[#allocation41_spill] sm:$0xff]  ;;  %v911_v39 = vadd.f32 %v2648_v38, %v2730_v6 }
 0x274   : > { %v912_v53 = vadd.f32 %v3095_v13, %v2724_v22 }
 0x275   : > { %v682_v26 = vmul.f32 0.5, %v680_v51  ;;  %v681_v44 = vadd.f32 %v679_v25, %v655_v52  ;;  %v3096_v25 = vld [vmem:[#allocation33_spill] sm:$0xff] }
 0x277   : > { %1879 = vtanh.f32 %v682_v26  ;;  %v683_v54 = vmul.f32 0.5, %v681_v44  ;;  %v910_v26 = vadd.f32 %v2646_v23, %v2730_v6  ;;  %v3100_v23 = vld [vmem:[#allocation17_spill] sm:$0xff] }
 0x278   : > { %v857_v55 = vpop.f32.mrf.mxu1 }
 0x279   : > { %1881 = vtanh.f32 %v683_v54  ;;  %v858_v2 = vadd.f32 %v857_v55, %v2710_v1  ;;  %v3097_v54 = vlaneseq }
 0x27a   : > { %v859_v29 = vpop.f32.mrf.mxu1 }
 0x27b   : > { %v860_v30 = vadd.f32 %v859_v29, %v2710_v1  ;;  %vm2826_vm1 = vcmp.lt.s32.totalorder %v3097_v54, 256 }
 0x27c   : > { %v863_v19 = vpop.f32.mrf.mxu1 }
 0x27d   : > { %v864_v15 = vadd.f32 %v863_v19, %v2688_v10  ;;  %v919_v38 = vadd.f32 %v911_v39, %v860_v30  ;;  %v918_v19 = vadd.f32 %v910_v26, %v858_v2  ;;  %v2848_v30 = vld [vmem:[%s3009_s2] sm:$0xff]  ;;  %v3110_v2 = vld [vmem:[#allocation3_spill] sm:$0xff] }
 0x27e   : > { %v865_v45 = vpop.f32.mrf.mxu1  ;;  %v1006_v13 = vmul.f32 %v3110_v2, %v2772_v32  ;;  %v3112_v2 = vld [vmem:[#allocation39_spill] sm:$0xff] }
 0x27f   : > { %v866_v36 = vadd.f32 %v865_v45, %v2688_v10  ;;  %v920_v44 = vadd.f32 %v912_v53, %v864_v15  ;;  %v3101_v45 = vld [vmem:[#allocation16_spill] sm:$0xff]  ;;  %v3111_v53 = vld [vmem:[#allocation7_spill] sm:$0xff] }
 0x280   : > { %v869_v48 = vpop.f32.mrf.mxu1 }
 0x281   : > { %v870_v5 = vadd.f32 %v869_v48, %v2498_v11  ;;  %v921_v51 = vadd.f32 %v913_v42, %v866_v36  ;;  %v3102_v48 = vld [vmem:[#allocation26_spill] sm:$0xff]  ;;  %v2864_v42 = vld [vmem:[%s3009_s2 + $0x10] sm:$0xff] }
 0x282   : > { %v871_v3 = vpop.f32.mrf.mxu1 }
 0x283   : > { %v872_v8 = vadd.f32 %v871_v3, %v2498_v11  ;;  %v922_v41 = vadd.f32 %v3096_v25, %v870_v5  ;;  %v1008_v25 = vmul.f32 %v3111_v53, %v2770_v33 }
 0x284   : > { %v1880_v24 = vpop.eup %1879  ;;  %v875_v63 = vpop.f32.mrf.mxu1 }
 0x285   : > { %v686_v21 = vadd.f32 1.0, %v1880_v24  ;;  %v876_v20 = vadd.f32 %v875_v63, %v2496_v37  ;;  %v923_v34 = vadd.f32 %v3093_v62, %v872_v8  ;;  %v3105_v24 = vld [vmem:[#allocation20_spill] sm:$0xff]  ;;  %v2872_v62 = vld [vmem:[%s3009_s2 + $0x18] sm:$0xff] }
 0x286   : > { %v1882_v59 = vpop.eup %1881  ;;  %v877_v49 = vpop.f32.mrf.mxu1 }
 0x287   : > { %v688_v58 = vmul.f32 0.5, %v686_v21  ;;  %v687_v35 = vadd.f32 1.0, %v1882_v59  ;;  %v878_v57 = vadd.f32 %v877_v49, %v2496_v37  ;;  %v924_v43 = vadd.f32 %v3091_v0, %v876_v20  ;;  %v3106_v21 = vld [vmem:[#allocation30_spill] sm:$0xff]  ;;  %v3107_v20 = vld [vmem:[#allocation29_spill] sm:$0xff] }
 0x289   : > { %v689_v31 = vmul.f32 0.5, %v687_v35  ;;  %v925_v40 = vadd.f32 %v3094_v18, %v878_v57 }
 0x28b   : > { %v692_v9 = vcombine.low %v688_v58, %v689_v31  ;;  %1883 = vtanh.f32 %v925_v40  ;;  %v3109_v40 = vld [vmem:[#allocation6_spill] sm:$0xff] }
 0x28c   : > { %1885 = vtanh.f32 %v924_v43 }
 0x28d   : > { %v699_v52 = vrot.slane %v692_v9, %v2801_v27  ;;  %1887 = vtanh.f32 %v923_v34  ;;  %v3108_v34 = vld [vmem:[#allocation13_spill] sm:$0xff]  ;;  %v1007_v9 = vmul.f32 %v3109_v40, %v2770_v33 }
 0x28e   : > { %1889 = vtanh.f32 %v922_v41  ;;  %v1005_v18 = vmul.f32 %v3108_v34, %v2772_v32  ;;  %v881_v41 = vpop.f32.mrf.mxu1 }
 0x28f   : > { %v706_v29 = vrot.slane %v699_v52, %v2801_v27  ;;  %1891 = vtanh.f32 %v921_v51  ;;  %v1010_v51 = vadd.f32 %v1008_v25, %v1006_v13  ;;  %v882_v26 = vadd.f32 %v881_v41, %v2774_v28  ;;  %v3113_v25 = vld [vmem:[#allocation44_spill] sm:$0xff] }
 0x290   : > { %1893 = vtanh.f32 %v920_v44  ;;  %v1009_v39 = vadd.f32 %v1007_v9, %v1005_v18  ;;  %v883_v52 = vpop.f32.mrf.mxu1  ;;  %v1244_v41 = vadd.f32 %v3113_v25, %v2724_v22 }
 0x291   : > { %712 = vst.msk [vmem:[%s2823_s30] sm:$0x3] %vm2826_vm1, %v706_v29  ;;  %1895 = vtanh.f32 %v919_v38  ;;  %v884_v54 = vadd.f32 %v883_v52, %v2774_v28  ;;  %v1012_v38 = vadd.f32 %v1010_v51, %v2784_v16  ;;  %v3115_v52 = vld [vmem:[#allocation40_spill] sm:$0xff] }
 0x292   : > { %1897 = vtanh.f32 %v918_v19  ;;  %v1011_v44 = vadd.f32 %v1009_v39, %v2784_v16  ;;  %v3114_v39 = vld [vmem:[#allocation38_spill] sm:$0xff] }
 0x293   : > { %1899 = vtanh.f32 %v3100_v23  ;;  %v1014_v23 = vadd.f32 %v1012_v38, %v884_v54  ;;  %v3116_v38 = vld [vmem:[#allocation43_spill] sm:$0xff] }
 0x294   : > { %1901 = vtanh.f32 %v3101_v45  ;;  %v1013_v29 = vadd.f32 %v1011_v44, %v882_v26 }
 0x295   : > { %1903 = vtanh.f32 %v3102_v48 }
 0x296   : > { %1905 = vtanh.f32 %v3103_v4 }
 0x297   : > { %1907 = vtanh.f32 %v3104_v46 }
 0x298   : > { %v1884_v3 = vpop.eup %1883  ;;  %1909 = vtanh.f32 %v3105_v24 }
 0x299   : > { %v1886_v63 = vpop.eup %1885  ;;  %1911 = vtanh.f32 %v3106_v21  ;;  %958 = vmatprep.subr.mxu0 %v1884_v3 }
 0x29a   : > { %v1888_v14 = vpop.eup %1887  ;;  %1913 = vtanh.f32 %v3107_v20  ;;  %959 = vmatpush1.msra.mxu0 %v1886_v63 }
 0x29b   : > { %v1890_v59 = vpop.eup %1889  ;;  %960 = vmatprep.subr.mxu0 %v1888_v14 }
 0x29c   : > { %v1892_v8 = vpop.eup %1891  ;;  %961 = vmatpush1.msra.mxu0 %v1890_v59 }
 0x29d   : > { %v1894_v49 = vpop.eup %1893  ;;  %962 = vmatprep.subr.mxu0 %v1892_v8 }
 0x29e   : > { %v1896_v58 = vpop.eup %1895  ;;  %963 = vmatpush1.msra.mxu0 %v1894_v49 }
 0x29f   : > { %v1898_v35 = vpop.eup %1897  ;;  %964 = vmatprep.subr.mxu0 %v1896_v58 }
 0x2a0   : > { %v1900_v5 = vpop.eup %1899  ;;  %965 = vmatpush1.msra.mxu0 %v1898_v35 }
 0x2a1   : > { %v1902_v36 = vpop.eup %1901  ;;  %1775 = vmatmul.mubr.msk.f32.vlgmr.msra.gmra.mxu0 %vm369_vm0, %v2680_v61  ;;  %1146 = vmatprep.subr.mxu0 %v1900_v5 }
 0x2a2   : > { %v1904_v57 = vpop.eup %1903  ;;  %1147 = vmatpush1.msra.mxu0 %v1902_v36  ;;  %1186 = vmatprep.mubr.f32.mxu0 %v3065_v56 }
 0x2a3   : > { %v1906_v31 = vpop.eup %1905  ;;  %1148 = vmatprep.subr.mxu0 %v1904_v57 }
 0x2a4   : > { %v1908_v7 = vpop.eup %1907  ;;  %1149 = vmatpush1.msra.mxu0 %v1906_v31 }
 0x2a5   : > { %v1910_v15 = vpop.eup %1909  ;;  %1150 = vmatprep.subr.mxu0 %v1908_v7 }
 0x2a6   : > { %v1912_v0 = vpop.eup %1911  ;;  %1151 = vmatpush1.msra.mxu0 %v1910_v15 }
 0x2a7   : > { %v1914_v43 = vpop.eup %1913  ;;  %1152 = vmatprep.subr.mxu0 %v1912_v0 }
 0x2a8   : > { %1153 = vmatpush1.msra.mxu0 %v1914_v43 }
 0x2a9   : > { %1776 = vmatmul.mubr.msk.f32.vlgmr.msra.gmra.mxu0 %vm369_vm0, %v2848_v30 }
 0x2aa   : > { %1192 = vmatprep.mubr.f32.mxu0 %v3065_v56 }
 0x2ad   : > { %1777 = vmatmul.mubr.msk.f32.gmra.mxu0 %vm369_vm0, %v2856_v12 }
 0x2ae   : > { %1198 = vmatprep.mubr.f32.mxu0 %v3065_v56 }
 0x2b1   : > { %1778 = vmatmul.mubr.msk.f32.gmra.mxu0 %vm369_vm0, %v2864_v42 }
 0x2b2   : > { %1204 = vmatprep.mubr.f32.mxu0 %v3065_v56 }
 0x2b5   : > { %1779 = vmatmul.mubr.msk.f32.gmra.mxu0 %vm369_vm0, %v2872_v62 }
 0x2b6   : > { %1210 = vmatprep.mubr.f32.mxu0 %v3065_v56 }
 0x2b9   : > { %1780 = vmatmul.mubr.msk.f32.gmra.mxu0 %vm369_vm0, %v2669_v60 }
 0x2ba   : > { %1660 = vmatprep.mubr.f32.mxu0 %v3065_v56 }
 0x361   : > { %v1000_v19 = vpop.f32.mrf.mxu0 }
 0x362   : > { %v1001_v45 = vadd.f32 %v1000_v19, %v2789_v47  ;;  %v3117_v19 = vld [vmem:[#allocation37_spill] sm:$0xff] }
 0x363   : > { %v1002_v48 = vpop.f32.mrf.mxu0 }
 0x364   : > { %v1015_v4 = vadd.f32 %v1013_v29, %v1001_v45  ;;  %v1003_v46 = vadd.f32 %v1002_v48, %v2789_v47  ;;  %v1243_v29 = vadd.f32 %v3116_v38, %v2724_v22  ;;  %v1242_v45 = vadd.f32 %v2656_v17, %v2730_v6  ;;  %v3118_v17 = vld [vmem:[#allocation19_spill] sm:$0xff] }
 0x366   : > { %v1017_v3 = vmul.f32 0.5, %v1015_v4  ;;  %v1016_v24 = vadd.f32 %v1014_v23, %v1003_v46  ;;  %v1241_v46 = vadd.f32 %v2654_v50, %v2730_v6  ;;  %v3120_v50 = vld [vmem:[#allocation28_spill] sm:$0xff] }
 0x368   : > { %1915 = vtanh.f32 %v1017_v3  ;;  %v1018_v63 = vmul.f32 0.5, %v1016_v24 }
 0x369   : > { %v1188_v21 = vpop.f32.mrf.mxu0 }
 0x36a   : > { %1917 = vtanh.f32 %v1018_v63  ;;  %v1189_v54 = vadd.f32 %v1188_v21, %v2710_v1 }
 0x36b   : > { %v1190_v14 = vpop.f32.mrf.mxu0 }
 0x36c   : > { %v1191_v53 = vadd.f32 %v1190_v14, %v2710_v1  ;;  %v1249_v21 = vadd.f32 %v1241_v46, %v1189_v54  ;;  %v3119_v14 = vld [vmem:[#allocation18_spill] sm:$0xff] }
 0x36d   : > { %v1194_v20 = vpop.f32.mrf.mxu0 }
 0x36e   : > { %v1195_v9 = vadd.f32 %v1194_v20, %v2688_v10  ;;  %v1250_v24 = vadd.f32 %v1242_v45, %v1191_v53  ;;  %v3121_v20 = vld [vmem:[#allocation27_spill] sm:$0xff] }
 0x36f   : > { %v1196_v59 = vpop.f32.mrf.mxu0 }
 0x370   : > { %v1197_v34 = vadd.f32 %v1196_v59, %v2688_v10  ;;  %v1251_v3 = vadd.f32 %v1243_v29, %v1195_v9  ;;  %v3122_v59 = vld [vmem:[#allocation23_spill] sm:$0xff] }
 0x371   : > { %v1200_v8 = vpop.f32.mrf.mxu0 }
 0x372   : > { %v1201_v43 = vadd.f32 %v1200_v8, %v2498_v11  ;;  %v1252_v48 = vadd.f32 %v1244_v41, %v1197_v34 }
 0x373   : > { %v1202_v49 = vpop.f32.mrf.mxu0 }
 0x374   : > { %v1203_v31 = vadd.f32 %v1202_v49, %v2498_v11  ;;  %v1253_v23 = vadd.f32 %v3117_v19, %v1201_v43  ;;  %v3123_v49 = vld [vmem:[#allocation22_spill] sm:$0xff] }
 0x375   : > { %v1916_v58 = vpop.eup %1915  ;;  %v1206_v35 = vpop.f32.mrf.mxu0 }
 0x376   : > { %v1021_v5 = vadd.f32 1.0, %v1916_v58  ;;  %v1207_v36 = vadd.f32 %v1206_v35, %v2496_v37  ;;  %v1254_v51 = vadd.f32 %v3114_v39, %v1203_v31  ;;  %v3124_v35 = vld [vmem:[#allocation32_spill] sm:$0xff] }
 0x377   : > { %v1918_v57 = vpop.eup %1917  ;;  %v1208_v7 = vpop.f32.mrf.mxu0  ;;  %v3128_v39 = vld [vmem:[#allocation4_spill] sm:$0xff] }
 0x378   : > { %v1023_v15 = vmul.f32 0.5, %v1021_v5  ;;  %v1022_v0 = vadd.f32 1.0, %v1918_v57  ;;  %v1209_v18 = vadd.f32 %v1208_v7, %v2496_v37  ;;  %v1255_v13 = vadd.f32 %v3112_v2, %v1207_v36  ;;  %v3125_v36 = vld [vmem:[#allocation31_spill] sm:$0xff] }
 0x37a   : > { %v1024_v40 = vmul.f32 0.5, %v1022_v0  ;;  %v1256_v26 = vadd.f32 %v3115_v52, %v1209_v18 }
 0x37c   : > { %v1027_v44 = vcombine.low %v1023_v15, %v1024_v40  ;;  %1919 = vtanh.f32 %v1256_v26  ;;  %v1212_v26 = vpop.f32.mrf.mxu0 }
 0x37d   : > { %1921 = vtanh.f32 %v1255_v13 }
 0x37e   : > { %v1034_v4 = vrot.slane %v1027_v44, %v2801_v27  ;;  %1923 = vtanh.f32 %v1254_v51  ;;  %v1337_v51 = vmul.f32 %v3128_v39, %v2772_v32  ;;  %v1214_v54 = vpop.f32.mrf.mxu0 }
 0x37f   : > { %1925 = vtanh.f32 %v1253_v23  ;;  %v1215_v38 = vadd.f32 %v1214_v54, %v2774_v28 }
 0x380   : > { %v1041_v63 = vrot.slane %v1034_v4, %v2801_v27  ;;  %1927 = vtanh.f32 %v1252_v48 }
 0x381   : > { %1929 = vtanh.f32 %v1251_v3 }
 0x382   : > { %1043 = vst.msk [vmem:[%s2823_s30 + $0x2] sm:$0x3] %vm2826_vm1, %v1041_v63  ;;  %1931 = vtanh.f32 %v1250_v24 }
 0x383   : > { %1933 = vtanh.f32 %v1249_v21 }
 0x384   : > { %1935 = vtanh.f32 %v3118_v17 }
 0x385   : > { %1937 = vtanh.f32 %v3119_v14 }
 0x386   : > { %1939 = vtanh.f32 %v3120_v50 }
 0x387   : > { %1941 = vtanh.f32 %v3121_v20 }
 0x388   : > { %1943 = vtanh.f32 %v3122_v59 }
 0x389   : > { %v1920_v8 = vpop.eup %1919  ;;  %1945 = vtanh.f32 %v3123_v49 }
 0x38a   : > { %v1922_v58 = vpop.eup %1921  ;;  %1947 = vtanh.f32 %v3124_v35  ;;  %1289 = vmatprep.subr.mxu1 %v1920_v8 }
 0x38b   : > { %v1924_v5 = vpop.eup %1923  ;;  %1949 = vtanh.f32 %v3125_v36  ;;  %1290 = vmatpush1.msra.mxu1 %v1922_v58 }
 0x38c   : > { %v1926_v57 = vpop.eup %1925  ;;  %1291 = vmatprep.subr.mxu1 %v1924_v5 }
 0x38d   : > { %v1928_v31 = vpop.eup %1927  ;;  %1292 = vmatpush1.msra.mxu1 %v1926_v57 }
 0x38e   : > { %v1930_v7 = vpop.eup %1929  ;;  %1293 = vmatprep.subr.mxu1 %v1928_v31 }
 0x38f   : > { %v1932_v15 = vpop.eup %1931  ;;  %1294 = vmatpush1.msra.mxu1 %v1930_v7 }
 0x390   : > { %v1934_v0 = vpop.eup %1933  ;;  %1295 = vmatprep.subr.mxu1 %v1932_v15 }
 0x391   : > { %v1936_v43 = vpop.eup %1935  ;;  %1296 = vmatpush1.msra.mxu1 %v1934_v0 }
 0x392   : > { %v1938_v34 = vpop.eup %1937  ;;  %1781 = vmatmul.mubr.msk.f32.vlgmr.msra.gmra.mxu1 %vm369_vm0, %v2680_v61  ;;  %1477 = vmatprep.subr.mxu1 %v1936_v43 }
 0x393   : > { %v1940_v18 = vpop.eup %1939  ;;  %1478 = vmatpush1.msra.mxu1 %v1938_v34  ;;  %1517 = vmatprep.mubr.f32.mxu1 %v3065_v56 }
 0x394   : > { %v1942_v40 = vpop.eup %1941  ;;  %1479 = vmatprep.subr.mxu1 %v1940_v18 }
 0x395   : > { %v1944_v9 = vpop.eup %1943  ;;  %1480 = vmatpush1.msra.mxu1 %v1942_v40 }
 0x396   : > { %v1946_v2 = vpop.eup %1945  ;;  %1481 = vmatprep.subr.mxu1 %v1944_v9  ;;  %v3130_v9 = vld [vmem:[#allocation49_spill] sm:$0xff] }
 0x397   : > { %v1948_v13 = vpop.eup %1947  ;;  %1482 = vmatpush1.msra.mxu1 %v1946_v2 }
 0x398   : > { %v1950_v53 = vpop.eup %1949  ;;  %1483 = vmatprep.subr.mxu1 %v1948_v13 }
 0x399   : > { %1484 = vmatpush1.msra.mxu1 %v1950_v53  ;;  %v3131_v53 = vld [vmem:[#allocation47_spill] sm:$0xff] }
 0x39a   : > { %1782 = vmatmul.mubr.msk.f32.vlgmr.msra.gmra.mxu1 %vm369_vm0, %v2848_v30  ;;  %v3126_v30 = vld [vmem:[#allocation14_spill] sm:$0xff] }
 0x39b   : > { %1523 = vmatprep.mubr.f32.mxu1 %v3065_v56  ;;  %v1336_v25 = vmul.f32 %v3126_v30, %v2772_v32  ;;  %v1575_v30 = vadd.f32 %v3131_v53, %v2724_v22 }
 0x39e   : > { %1783 = vmatmul.mubr.msk.f32.gmra.mxu1 %vm369_vm0, %v2856_v12  ;;  %v3127_v12 = vld [vmem:[#allocation8_spill] sm:$0xff] }
 0x39f   : > { %1529 = vmatprep.mubr.f32.mxu1 %v3065_v56  ;;  %v1338_v41 = vmul.f32 %v3127_v12, %v2770_v33 }
 0x3a1   : > { %v1340_v44 = vadd.f32 %v1338_v41, %v1336_v25  ;;  %v3132_v25 = vld [vmem:[#allocation48_spill] sm:$0xff]  ;;  %v3133_v41 = vld [vmem:[#allocation50_spill] sm:$0xff] }
 0x3a2   : > { %1784 = vmatmul.mubr.msk.f32.gmra.mxu1 %vm369_vm0, %v2864_v42  ;;  %v3129_v42 = vld [vmem:[#allocation9_spill] sm:$0xff] }
 0x3a3   : > { %1535 = vmatprep.mubr.f32.mxu1 %v3065_v56  ;;  %v1339_v52 = vmul.f32 %v3129_v42, %v2770_v33  ;;  %v3134_v42 = vld [vmem:[#allocation46_spill] sm:$0xff] }
 0x3a6   : > { %1785 = vmatmul.mubr.msk.f32.gmra.mxu1 %vm369_vm0, %v2872_v62  ;;  %v1341_v62 = vadd.f32 %v1339_v52, %v1337_v51  ;;  %v3135_v52 = vld [vmem:[#allocation45_spill] sm:$0xff] }
 0x3a7   : > { %1541 = vmatprep.mubr.f32.mxu1 %v3065_v56  ;;  %v1213_v56 = vadd.f32 %v1212_v26, %v2774_v28  ;;  %v3136_v26 = vld [vmem:[#allocation52_spill] sm:$0xff] }
 0x3a8   : > { %v1343_v29 = vadd.f32 %v1341_v62, %v2784_v16 }
 0x3aa   : > { %1786 = vmatmul.mubr.msk.f32.gmra.mxu1 %vm369_vm0, %v2669_v60  ;;  %v1342_v60 = vadd.f32 %v1340_v44, %v2784_v16  ;;  %v1345_v45 = vadd.f32 %v1343_v29, %v1215_v38  ;;  %v1573_v44 = vadd.f32 %v3136_v26, %v2730_v6 }
 0x3ac   : > { %v1344_v19 = vadd.f32 %v1342_v60, %v1213_v56  ;;  %v3137_v56 = vld [vmem:[#allocation51_spill] sm:$0xff] }
 0x3ad   : > { %v1572_v60 = vadd.f32 %v3137_v56, %v2730_v6 }
 0x452   : > { %v1331_v23 = vpop.f32.mrf.mxu1 }
 0x453   : > { %v1332_v48 = vadd.f32 %v1331_v23, %v2789_v47 }
 0x454   : > { %v1333_v4 = vpop.f32.mrf.mxu1 }
 0x455   : > { %v1346_v46 = vadd.f32 %v1344_v19, %v1332_v48  ;;  %v1334_v3 = vadd.f32 %v1333_v4, %v2789_v47 }
 0x457   : > { %v1348_v24 = vmul.f32 0.5, %v1346_v46  ;;  %v1347_v63 = vadd.f32 %v1345_v45, %v1334_v3 }
 0x459   : > { %1951 = vtanh.f32 %v1348_v24  ;;  %v1349_v21 = vmul.f32 0.5, %v1347_v63  ;;  %v3138_v24 = vld [vmem:[#allocation15_spill] sm:$0xff] }
 0x45a   : > { %v1519_v17 = vpop.f32.mrf.mxu1  ;;  %v1667_v63 = vmul.f32 %v3138_v24, %v2772_v32 }
 0x45b   : > { %1953 = vtanh.f32 %v1349_v21  ;;  %v3139_v21 = vld [vmem:[#allocation10_spill] sm:$0xff] }
 0x45c   : > { %v1521_v14 = vpop.f32.mrf.mxu1 }
 0x45d   : > { %v1522_v13 = vadd.f32 %v1521_v14, %v2710_v1  ;;  %v3140_v14 = vld [vmem:[#allocation5_spill] sm:$0xff] }
 0x45e   : > { %v1525_v50 = vpop.f32.mrf.mxu1 }
 0x45f   : > { %v1526_v40 = vadd.f32 %v1525_v50, %v2688_v10  ;;  %v1581_v29 = vadd.f32 %v1573_v44, %v1522_v13  ;;  %v1668_v50 = vmul.f32 %v3140_v14, %v2772_v32 }
 0x460   : > { %v1527_v20 = vpop.f32.mrf.mxu1 }
 0x461   : > { %v1528_v43 = vadd.f32 %v1527_v20, %v2688_v10  ;;  %v3141_v20 = vld [vmem:[#allocation11_spill] sm:$0xff] }
 0x462   : > { %v1531_v59 = vpop.f32.mrf.mxu1 }
 0x463   : > { %v1532_v0 = vadd.f32 %v1531_v59, %v2498_v11  ;;  %v1583_v62 = vadd.f32 %v1575_v30, %v1528_v43  ;;  %v1670_v59 = vmul.f32 %v3141_v20, %v2770_v33 }
 0x464   : > { %v1533_v8 = vpop.f32.mrf.mxu1 }
 0x465   : > { %v1534_v57 = vadd.f32 %v1533_v8, %v2498_v11  ;;  %v1520_v11 = vadd.f32 %v1519_v17, %v2710_v1  ;;  %v1584_v10 = vadd.f32 %v3135_v52, %v1532_v0  ;;  %v1669_v17 = vmul.f32 %v3139_v21, %v2770_v33 }
 0x466   : > { %v1952_v49 = vpop.eup %1951  ;;  %v1537_v58 = vpop.f32.mrf.mxu1 }
 0x467   : > { %v1352_v35 = vadd.f32 1.0, %v1952_v49  ;;  %v1538_v5 = vadd.f32 %v1537_v58, %v2496_v37  ;;  %v1585_v12 = vadd.f32 %v3132_v25, %v1534_v57  ;;  %v1580_v19 = vadd.f32 %v1572_v60, %v1520_v11 }
 0x468   : > { %v1954_v36 = vpop.eup %1953  ;;  %v1539_v31 = vpop.f32.mrf.mxu1  ;;  %v1671_v49 = vadd.f32 %v1669_v17, %v1667_v63  ;;  %v1672_v58 = vadd.f32 %v1670_v59, %v1668_v50 }
 0x469   : > { %v1354_v7 = vmul.f32 0.5, %v1352_v35  ;;  %v1353_v15 = vadd.f32 1.0, %v1954_v36  ;;  %v1540_v34 = vadd.f32 %v1539_v31, %v2496_v37  ;;  %v1586_v2 = vadd.f32 %v3130_v9, %v1538_v5 }
 0x46a   : > { %v1574_v37 = vadd.f32 %v3134_v42, %v2724_v22  ;;  %v1543_v8 = vpop.f32.mrf.mxu1  ;;  %v1674_v57 = vadd.f32 %v1672_v58, %v2784_v16 }
 0x46b   : > { %v1355_v18 = vmul.f32 0.5, %v1353_v15  ;;  %v1587_v39 = vadd.f32 %v3133_v41, %v1540_v34  ;;  %v1544_v5 = vadd.f32 %v1543_v8, %v2774_v28 }
 0x46c   : > { %v1582_v38 = vadd.f32 %v1574_v37, %v1526_v40  ;;  %v1545_v35 = vpop.f32.mrf.mxu1 }
 0x46d   : > { %v1358_v51 = vcombine.low %v1354_v7, %v1355_v18  ;;  %1955 = vtanh.f32 %v1587_v39  ;;  %v1546_v36 = vadd.f32 %v1545_v35, %v2774_v28 }
 0x46e   : > { %1957 = vtanh.f32 %v1586_v2 }
 0x46f   : > { %v1365_v54 = vrot.slane %v1358_v51, %v2801_v27  ;;  %1959 = vtanh.f32 %v1585_v12  ;;  %v1676_v0 = vadd.f32 %v1674_v57, %v1546_v36 }
 0x470   : > { %1961 = vtanh.f32 %v1584_v10 }
 0x471   : > { %v1372_v1 = vrot.slane %v1365_v54, %v2801_v27  ;;  %1963 = vtanh.f32 %v1583_v62 }
 0x472   : > { %1965 = vtanh.f32 %v1582_v38 }
 0x473   : > { %1374 = vst.msk [vmem:[%s2823_s30 + $0x4] sm:$0x3] %vm2826_vm1, %v1372_v1  ;;  %1967 = vtanh.f32 %v1581_v29 }
 0x474   : > { %1969 = vtanh.f32 %v1580_v19 }
 0x47a   : > { %v1956_v22 = vpop.eup %1955 }
 0x47b   : > { %v1958_v23 = vpop.eup %1957  ;;  %1620 = vmatprep.subr.mxu0 %v1956_v22 }
 0x47c   : > { %v1960_v45 = vpop.eup %1959  ;;  %1621 = vmatpush1.msra.mxu0 %v1958_v23 }
 0x47d   : > { %v1962_v6 = vpop.eup %1961  ;;  %1622 = vmatprep.subr.mxu0 %v1960_v45 }
 0x47e   : > { %v1964_v48 = vpop.eup %1963  ;;  %1623 = vmatpush1.msra.mxu0 %v1962_v6 }
 0x47f   : > { %v1966_v4 = vpop.eup %1965  ;;  %1624 = vmatprep.subr.mxu0 %v1964_v48 }
 0x480   : > { %v1968_v46 = vpop.eup %1967  ;;  %1625 = vmatpush1.msra.mxu0 %v1966_v4 }
 0x481   : > { %v1970_v3 = vpop.eup %1969  ;;  %1626 = vmatprep.subr.mxu0 %v1968_v46 }
 0x482   : > { %1627 = vmatpush1.msra.mxu0 %v1970_v3 }
 0x483   : > { %1787 = vmatmul.mubr.msk.f32.vlgmr.msra.gmra.mxu0 %vm369_vm0, %v2680_v61  ;;  %v1673_v61 = vadd.f32 %v1671_v49, %v2784_v16 }
 0x485   : > { %v1675_v7 = vadd.f32 %v1673_v61, %v1544_v5 }
 0x543   : > { %v1662_v31 = vpop.f32.mrf.mxu0 }
 0x544   : > { %v1663_v15 = vadd.f32 %v1662_v31, %v2789_v47 }
 0x545   : > { %v1664_v32 = vpop.f32.mrf.mxu0 }
 0x546   : > { %v1677_v43 = vadd.f32 %v1675_v7, %v1663_v15  ;;  %v1665_v33 = vadd.f32 %v1664_v32, %v2789_v47 }
 0x548   : > { %v1679_v34 = vmul.f32 0.5, %v1677_v43  ;;  %v1678_v18 = vadd.f32 %v1676_v0, %v1665_v33 }
 0x54a   : > { %1971 = vtanh.f32 %v1679_v34  ;;  %v1680_v40 = vmul.f32 0.5, %v1678_v18 }
 0x54c   : > { %1973 = vtanh.f32 %v1680_v40 }
 0x557   : > { %v1972_v9 = vpop.eup %1971 }
 0x558   : > { %v1683_v2 = vadd.f32 1.0, %v1972_v9 }
 0x559   : > { %v1974_v28 = vpop.eup %1973 }
 0x55a   : > { %v1684_v13 = vadd.f32 1.0, %v1974_v28  ;;  %v1685_v16 = vmul.f32 0.5, %v1683_v2 }
 0x55c   : > { %v1686_v53 = vmul.f32 0.5, %v1684_v13 }
 0x55e   : > { %v1689_v30 = vcombine.low %v1685_v16, %v1686_v53 }
 0x560   : > { %v1696_v25 = vrot.slane %v1689_v30, %v2801_v27 }
 0x562   : > { %v1703_v12 = vrot.slane %v1696_v25, %v2801_v27 }
 0x564   : > { %1705 = vst.msk [vmem:[%s2823_s30 + $0x6] sm:$0x3] %vm2826_vm1, %v1703_v12 }
 0x565 PF: > { %s14_s15 = sadd.s32 1, %s1985_s15  }
 0x566   : > { %p11_p4 = scmp.ge.s32.totalorder %s14_s15, 4  }
 0x568   :  { %13 = sbr.rel (!%p11_p4) target bundleno = 1 (0x1), region = 66 }

</bundles_post_ra>
